<compile_context>
chip_gen: v7x
topology: tpu7x:2x2x1
jax: 0.10.0
libtpu: 0.0.40
codegen_flags: <defaults>
</compile_context>

<pallas_src>
import jax
import jax.numpy as jnp
import numpy as np
from jax.experimental import pallas as pl
from jax.experimental.pallas import tpu as pltpu

STATNUM = 32          # len(e.getstat()) — env dependent; constant here
MUSCLENUM = 8         # sum of muscles over creatures — env dependent
HIDDEN = 30           # true hidden width of the torch module
HID = 32              # padded hidden width (sublane aligned)
NLAYERS = 6
OUT = 2 * MUSCLENUM   # 16

SPAD = HID            # padded statnum rows of x^T (requires STATNUM <= HID)
assert STATNUM <= SPAD

# Packed parameter slab: one lane-dense (96, 128) f32 buffer.
#   row group 0 (rows  0..31): [ W1^T | Wh0^T | Wh1^T | Wh2^T ]   (32x32 tiles)
#   row group 1 (rows 32..63): [ Wh3^T | Wh4^T | Wh5^T | W2d^T ]  (W2d^T rows padded 16->32)
#   row group 2 (rows 64..95): biases as columns: col 0 = b1, cols 1..6 = bh, col 7 = b2d
PROWS = 3 * HID
PLANES = 128
NTILES_PER_GROUP = PLANES // HID   # 4


def mlp_kernel(x_ref, p_ref, o_ref):
    # x_ref: (SPAD, TM)      — batch on the lane axis
    # p_ref: (PROWS, PLANES) — all weights + biases, VMEM resident
    # o_ref: (OUT, TM)
    tm = x_ref.shape[1]
    # Two independent sub-batches -> two independent matmul chains the LLO
    # scheduler can interleave (hides MXU result-FIFO drain on v5e/v6e).
    nsplit = 2 if tm % 256 == 0 else 1
    sub = tm // nsplit

    def wtile(idx):
        rg, c = divmod(idx, NTILES_PER_GROUP)
        return p_ref[rg * HID:(rg + 1) * HID, c * HID:(c + 1) * HID]

    def bcol(idx, rows=HID):
        return p_ref[2 * HID:2 * HID + rows, idx:idx + 1]

    for s in range(nsplit):
        x = x_ref[:, s * sub:(s + 1) * sub]
        # f1 + ReLU :  (HID, SPAD) @ (SPAD, sub);  bias is a lane splat
        h = jnp.maximum(
            jnp.dot(wtile(0), x, preferred_element_type=jnp.float32) + bcol(0),
            0.0)
        # 6 residual-ReLU hidden layers: h = h + relu(W^T h + b)
        for l in range(NLAYERS):
            h = h + jnp.maximum(
                jnp.dot(wtile(1 + l), h, preferred_element_type=jnp.float32)
                + bcol(1 + l), 0.0)
        # f2 with the pair-swap folded in:  d[j] = y[j] - y[j^1]
        w2t = p_ref[HID:HID + OUT, 3 * HID:4 * HID]            # (OUT, HID)
        d = jnp.dot(w2t, h, preferred_element_type=jnp.float32) + bcol(7, OUT)
        # pairwise softmax == sigmoid of the pair difference (single EUP tanh)
        o_ref[:, s * sub:(s + 1) * sub] = 0.5 * jnp.tanh(0.5 * d) + 0.5


def pack_params(w1, b1, wh, bh, w2, b2):
    """Pack all parameters into one lane-dense (PROWS, PLANES) f32 slab.

    Host weight convention: forward is x @ W + b with W: (in, out).  In the
    kernel the batch lives on lanes, so weights are stored transposed
    (out, in) and each layer is W^T @ h.  The pairwise-softmax partner
    permutation is folded into f2 here.
    """
    w1 = np.asarray(w1, np.float32)
    b1 = np.asarray(b1, np.float32)
    wh = np.asarray(wh, np.float32)
    bh = np.asarray(bh, np.float32)
    w2 = np.asarray(w2, np.float32)
    b2 = np.asarray(b2, np.float32)

    idx = np.arange(OUT)
    perm = np.zeros((OUT, OUT), np.float32)
    perm[idx, idx ^ 1] = 1.0
    w2d = w2 - w2 @ perm          # (HIDDEN, OUT)
    b2d = b2 - b2 @ perm          # (OUT,)

    tiles = []
    t = np.zeros((HID, HID), np.float32)
    t[:HIDDEN, :STATNUM] = w1.T
    tiles.append(t)
    for l in range(NLAYERS):
        t = np.zeros((HID, HID), np.float32)
        t[:HIDDEN, :HIDDEN] = wh[l].T
        tiles.append(t)
    t = np.zeros((HID, HID), np.float32)
    t[:OUT, :HIDDEN] = w2d.T
    tiles.append(t)

    buf = np.zeros((PROWS, PLANES), np.float32)
    for i, t in enumerate(tiles):
        rg, c = divmod(i, NTILES_PER_GROUP)
        buf[rg * HID:(rg + 1) * HID, c * HID:(c + 1) * HID] = t
    buf[2 * HID:2 * HID + HIDDEN, 0] = b1
    for l in range(NLAYERS):
        buf[2 * HID:2 * HID + HIDDEN, 1 + l] = bh[l]
    buf[2 * HID:2 * HID + OUT, 7] = b2d
    return jnp.asarray(buf)


def model_forward(x_batch, packed, tm_cap=512):
    """x_batch: (M, STATNUM) f32 -> (M, OUT) f32 (per-row == torch forward)."""
    x_batch = jnp.asarray(x_batch, jnp.float32)
    M = x_batch.shape[0]
    # Batch on the lane axis: pad to a multiple of 128 and pick a big block so
    # there are few grid steps; batches >= 2*TM keep >=2 parallel blocks (v7x).
    m128 = max(128, -(-M // 128) * 128)
    TM = min(tm_cap, m128)
    Mp = -(-m128 // TM) * TM
    grid = (Mp // TM,)

    x_t = jnp.transpose(x_batch)                              # (STATNUM, M)
    x_t = jnp.pad(x_t, ((0, SPAD - STATNUM), (0, Mp - M)))    # (SPAD, Mp)

    out_t = pl.pallas_call(
        mlp_kernel,
        out_shape=jax.ShapeDtypeStruct((OUT, Mp), jnp.float32),
        grid=grid,
        in_specs=[
            pl.BlockSpec((SPAD, TM), lambda i: (0, i)),
            # same block every grid step -> DMA'd once, stays VMEM-resident
            pl.BlockSpec((PROWS, PLANES), lambda i: (0, 0)),
        ],
        out_specs=pl.BlockSpec((OUT, TM), lambda i: (0, i)),
        compiler_params=pltpu.CompilerParams(
            dimension_semantics=("parallel",)),
    )(x_t, packed)
    return jnp.transpose(out_t)[:M]


def model_forward_single(x_1d, packed):
    """Original 1-D module semantics: (STATNUM,) -> (OUT,).
    Avoid in hot loops; batch many states into one model_forward call instead."""
    return model_forward(x_1d.reshape(1, STATNUM), packed)[0]


def reference_forward(x_batch, w1, b1, wh, bh, w2, b2):
    h = jnp.maximum(x_batch @ w1 + b1, 0.0)
    for l in range(NLAYERS):
        h = h + jnp.maximum(h @ wh[l] + bh[l], 0.0)
    y = h @ w2 + b2
    return jax.nn.softmax(y.reshape(-1, MUSCLENUM, 2), axis=-1).reshape(-1, OUT)


# TODO(synk): the env/physics simulation, reward shaping and model.choice
# (host-side np.random.choice sampling) have no tensor-op Pallas equivalent;
# only model.forward is implemented as a kernel.

if __name__ == "__main__":
    key = jax.random.PRNGKey(0)
    keys = jax.random.split(key, 20)

    def uinit(k, shape, fan_in):
        bound = 1.0 / float(np.sqrt(fan_in))
        return jax.random.uniform(k, shape, jnp.float32, -bound, bound)

    # deterministic parameter init (PyTorch-Linear-style uniform)
    w1 = uinit(keys[0], (STATNUM, HIDDEN), STATNUM)
    b1 = uinit(keys[1], (HIDDEN,), STATNUM)
    wh = jnp.stack([uinit(keys[2 + i], (HIDDEN, HIDDEN), HIDDEN) for i in range(NLAYERS)])
    bh = jnp.stack([uinit(keys[8 + i], (HIDDEN,), HIDDEN) for i in range(NLAYERS)])
    w2 = uinit(keys[14], (HIDDEN, OUT), HIDDEN)
    b2 = uinit(keys[15], (OUT,), HIDDEN)

    packed = pack_params(w1, b1, wh, bh, w2, b2)

    # batched forward: 256 creature states in one pallas_call (grid of 1, TM=256)
    M = 256
    x = jax.random.normal(keys[16], (M, STATNUM), jnp.float32)
    out = jax.block_until_ready(model_forward(x, packed))
    ref = reference_forward(x, w1, b1, wh, bh, w2, b2)
    np.testing.assert_allclose(np.asarray(out), np.asarray(ref), rtol=1e-3, atol=1e-3)

    # each consecutive pair sums to 1
    pair_sums = np.asarray(out).reshape(M, MUSCLENUM, 2).sum(axis=-1)
    np.testing.assert_allclose(pair_sums, np.ones((M, MUSCLENUM)), rtol=1e-3, atol=1e-3)

    # non-multiple-of-128 batch -> exercises padding + multi-block grid (TM=512, grid=2)
    M2 = 1000
    x2 = jax.random.normal(keys[18], (M2, STATNUM), jnp.float32)
    out2 = jax.block_until_ready(model_forward(x2, packed))
    ref2 = reference_forward(x2, w1, b1, wh, bh, w2, b2)
    np.testing.assert_allclose(np.asarray(out2), np.asarray(ref2), rtol=1e-3, atol=1e-3)

    # original 1-D (single-sample) semantics
    x1 = jax.random.normal(keys[17], (STATNUM,), jnp.float32)
    out1 = jax.block_until_ready(model_forward_single(x1, packed))
    ref1 = reference_forward(x1.reshape(1, STATNUM), w1, b1, wh, bh, w2, b2)[0]
    np.testing.assert_allclose(np.asarray(out1), np.asarray(ref1), rtol=1e-3, atol=1e-3)

    print("KERNEL_OK")
</pallas_src>

<mosaic_0001>
module attributes {stable_mosaic.version = 11 : i64} {
  func.func @mlp_kernel(%arg0: i32, %arg1: memref<32x256xf32, #tpu.memory_space<vmem>>, %arg2: memref<96x128xf32, #tpu.memory_space<vmem>>, %arg3: memref<16x256xf32, #tpu.memory_space<vmem>>) attributes {dimension_semantics = [#tpu.dimension_semantics<parallel>], iteration_bounds = array<i64: 1>, scalar_prefetch = 0 : i64, scratch_operands = 0 : i64, tpu.core_type = #tpu.core_type<tc>, window_params = [{transform_indices = @transform_0, window_bounds = array<i64: 32, 256>}, {pipeline_mode = #tpu.pipeline_mode<synchronous>, transform_indices = @transform_1, window_bounds = array<i64: 96, 128>}, {transform_indices = @transform_2, window_bounds = array<i64: 16, 256>}]} {
    %c0 = arith.constant 0 : index
    %c0_0 = arith.constant 0 : index
    %0 = vector.load %arg1[%c0, %c0_0] : memref<32x256xf32, #tpu.memory_space<vmem>>, vector<32x128xf32>
    %c0_1 = arith.constant 0 : index
    %c0_2 = arith.constant 0 : index
    %1 = vector.load %arg2[%c0_1, %c0_2] : memref<96x128xf32, #tpu.memory_space<vmem>>, vector<32x32xf32>
    %cst = arith.constant dense<0.000000e+00> : vector<32x128xf32>
    %2 = tpu.matmul %1, %0, %cst {dimension_numbers = #tpu.dot_dimension_numbers<[1], [0], [0], [1], [0, 0, 1, 1], [], []>} : vector<32x32xf32>, vector<32x128xf32>, vector<32x128xf32> -> vector<32x128xf32>
    %c64 = arith.constant 64 : index
    %c0_3 = arith.constant 0 : index
    %3 = vector.load %arg2[%c64, %c0_3] : memref<96x128xf32, #tpu.memory_space<vmem>>, vector<32x1xf32>
    %4 = vector.broadcast %3 : vector<32x1xf32> to vector<32x128xf32>
    %5 = arith.addf %2, %4 : vector<32x128xf32>
    %cst_4 = arith.constant 0.000000e+00 : f32
    %6 = vector.broadcast %cst_4 : f32 to vector<32x128xf32>
    %7 = arith.maximumf %5, %6 : vector<32x128xf32>
    %c0_5 = arith.constant 0 : index
    %c32 = arith.constant 32 : index
    %8 = vector.load %arg2[%c0_5, %c32] : memref<96x128xf32, #tpu.memory_space<vmem>>, vector<32x32xf32>
    %cst_6 = arith.constant dense<0.000000e+00> : vector<32x128xf32>
    %9 = tpu.matmul %8, %7, %cst_6 {dimension_numbers = #tpu.dot_dimension_numbers<[1], [0], [0], [1], [0, 0, 1, 1], [], []>} : vector<32x32xf32>, vector<32x128xf32>, vector<32x128xf32> -> vector<32x128xf32>
    %c64_7 = arith.constant 64 : index
    %c1 = arith.constant 1 : index
    %10 = vector.load %arg2[%c64_7, %c1] : memref<96x128xf32, #tpu.memory_space<vmem>>, vector<32x1xf32>
    %11 = vector.broadcast %10 : vector<32x1xf32> to vector<32x128xf32>
    %12 = arith.addf %9, %11 : vector<32x128xf32>
    %cst_8 = arith.constant 0.000000e+00 : f32
    %13 = vector.broadcast %cst_8 : f32 to vector<32x128xf32>
    %14 = arith.maximumf %12, %13 : vector<32x128xf32>
    %15 = arith.addf %7, %14 : vector<32x128xf32>
    %c0_9 = arith.constant 0 : index
    %c64_10 = arith.constant 64 : index
    %16 = vector.load %arg2[%c0_9, %c64_10] : memref<96x128xf32, #tpu.memory_space<vmem>>, vector<32x32xf32>
    %cst_11 = arith.constant dense<0.000000e+00> : vector<32x128xf32>
    %17 = tpu.matmul %16, %15, %cst_11 {dimension_numbers = #tpu.dot_dimension_numbers<[1], [0], [0], [1], [0, 0, 1, 1], [], []>} : vector<32x32xf32>, vector<32x128xf32>, vector<32x128xf32> -> vector<32x128xf32>
    %c64_12 = arith.constant 64 : index
    %c2 = arith.constant 2 : index
    %18 = vector.load %arg2[%c64_12, %c2] : memref<96x128xf32, #tpu.memory_space<vmem>>, vector<32x1xf32>
    %19 = vector.broadcast %18 : vector<32x1xf32> to vector<32x128xf32>
    %20 = arith.addf %17, %19 : vector<32x128xf32>
    %cst_13 = arith.constant 0.000000e+00 : f32
    %21 = vector.broadcast %cst_13 : f32 to vector<32x128xf32>
    %22 = arith.maximumf %20, %21 : vector<32x128xf32>
    %23 = arith.addf %15, %22 : vector<32x128xf32>
    %c0_14 = arith.constant 0 : index
    %c96 = arith.constant 96 : index
    %24 = vector.load %arg2[%c0_14, %c96] : memref<96x128xf32, #tpu.memory_space<vmem>>, vector<32x32xf32>
    %cst_15 = arith.constant dense<0.000000e+00> : vector<32x128xf32>
    %25 = tpu.matmul %24, %23, %cst_15 {dimension_numbers = #tpu.dot_dimension_numbers<[1], [0], [0], [1], [0, 0, 1, 1], [], []>} : vector<32x32xf32>, vector<32x128xf32>, vector<32x128xf32> -> vector<32x128xf32>
    %c64_16 = arith.constant 64 : index
    %c3 = arith.constant 3 : index
    %26 = vector.load %arg2[%c64_16, %c3] : memref<96x128xf32, #tpu.memory_space<vmem>>, vector<32x1xf32>
    %27 = vector.broadcast %26 : vector<32x1xf32> to vector<32x128xf32>
    %28 = arith.addf %25, %27 : vector<32x128xf32>
    %cst_17 = arith.constant 0.000000e+00 : f32
    %29 = vector.broadcast %cst_17 : f32 to vector<32x128xf32>
    %30 = arith.maximumf %28, %29 : vector<32x128xf32>
    %31 = arith.addf %23, %30 : vector<32x128xf32>
    %c32_18 = arith.constant 32 : index
    %c0_19 = arith.constant 0 : index
    %32 = vector.load %arg2[%c32_18, %c0_19] : memref<96x128xf32, #tpu.memory_space<vmem>>, vector<32x32xf32>
    %cst_20 = arith.constant dense<0.000000e+00> : vector<32x128xf32>
    %33 = tpu.matmul %32, %31, %cst_20 {dimension_numbers = #tpu.dot_dimension_numbers<[1], [0], [0], [1], [0, 0, 1, 1], [], []>} : vector<32x32xf32>, vector<32x128xf32>, vector<32x128xf32> -> vector<32x128xf32>
    %c64_21 = arith.constant 64 : index
    %c4 = arith.constant 4 : index
    %34 = vector.load %arg2[%c64_21, %c4] : memref<96x128xf32, #tpu.memory_space<vmem>>, vector<32x1xf32>
    %35 = vector.broadcast %34 : vector<32x1xf32> to vector<32x128xf32>
    %36 = arith.addf %33, %35 : vector<32x128xf32>
    %cst_22 = arith.constant 0.000000e+00 : f32
    %37 = vector.broadcast %cst_22 : f32 to vector<32x128xf32>
    %38 = arith.maximumf %36, %37 : vector<32x128xf32>
    %39 = arith.addf %31, %38 : vector<32x128xf32>
    %c32_23 = arith.constant 32 : index
    %c32_24 = arith.constant 32 : index
    %40 = vector.load %arg2[%c32_23, %c32_24] : memref<96x128xf32, #tpu.memory_space<vmem>>, vector<32x32xf32>
    %cst_25 = arith.constant dense<0.000000e+00> : vector<32x128xf32>
    %41 = tpu.matmul %40, %39, %cst_25 {dimension_numbers = #tpu.dot_dimension_numbers<[1], [0], [0], [1], [0, 0, 1, 1], [], []>} : vector<32x32xf32>, vector<32x128xf32>, vector<32x128xf32> -> vector<32x128xf32>
    %c64_26 = arith.constant 64 : index
    %c5 = arith.constant 5 : index
    %42 = vector.load %arg2[%c64_26, %c5] : memref<96x128xf32, #tpu.memory_space<vmem>>, vector<32x1xf32>
    %43 = vector.broadcast %42 : vector<32x1xf32> to vector<32x128xf32>
    %44 = arith.addf %41, %43 : vector<32x128xf32>
    %cst_27 = arith.constant 0.000000e+00 : f32
    %45 = vector.broadcast %cst_27 : f32 to vector<32x128xf32>
    %46 = arith.maximumf %44, %45 : vector<32x128xf32>
    %47 = arith.addf %39, %46 : vector<32x128xf32>
    %c32_28 = arith.constant 32 : index
    %c64_29 = arith.constant 64 : index
    %48 = vector.load %arg2[%c32_28, %c64_29] : memref<96x128xf32, #tpu.memory_space<vmem>>, vector<32x32xf32>
    %cst_30 = arith.constant dense<0.000000e+00> : vector<32x128xf32>
    %49 = tpu.matmul %48, %47, %cst_30 {dimension_numbers = #tpu.dot_dimension_numbers<[1], [0], [0], [1], [0, 0, 1, 1], [], []>} : vector<32x32xf32>, vector<32x128xf32>, vector<32x128xf32> -> vector<32x128xf32>
    %c64_31 = arith.constant 64 : index
    %c6 = arith.constant 6 : index
    %50 = vector.load %arg2[%c64_31, %c6] : memref<96x128xf32, #tpu.memory_space<vmem>>, vector<32x1xf32>
    %51 = vector.broadcast %50 : vector<32x1xf32> to vector<32x128xf32>
    %52 = arith.addf %49, %51 : vector<32x128xf32>
    %cst_32 = arith.constant 0.000000e+00 : f32
    %53 = vector.broadcast %cst_32 : f32 to vector<32x128xf32>
    %54 = arith.maximumf %52, %53 : vector<32x128xf32>
    %55 = arith.addf %47, %54 : vector<32x128xf32>
    %c32_33 = arith.constant 32 : index
    %c96_34 = arith.constant 96 : index
    %56 = vector.load %arg2[%c32_33, %c96_34] : memref<96x128xf32, #tpu.memory_space<vmem>>, vector<16x32xf32>
    %cst_35 = arith.constant dense<0.000000e+00> : vector<16x128xf32>
    %57 = tpu.matmul %56, %55, %cst_35 {dimension_numbers = #tpu.dot_dimension_numbers<[1], [0], [0], [1], [0, 0, 1, 1], [], []>} : vector<16x32xf32>, vector<32x128xf32>, vector<16x128xf32> -> vector<16x128xf32>
    %c64_36 = arith.constant 64 : index
    %c7 = arith.constant 7 : index
    %58 = vector.load %arg2[%c64_36, %c7] : memref<96x128xf32, #tpu.memory_space<vmem>>, vector<16x1xf32>
    %59 = vector.broadcast %58 : vector<16x1xf32> to vector<16x128xf32>
    %60 = arith.addf %57, %59 : vector<16x128xf32>
    %cst_37 = arith.constant 5.000000e-01 : f32
    %61 = vector.broadcast %cst_37 : f32 to vector<16x128xf32>
    %62 = arith.mulf %61, %60 : vector<16x128xf32>
    %63 = math.tanh %62 : vector<16x128xf32>
    %cst_38 = arith.constant 5.000000e-01 : f32
    %64 = vector.broadcast %cst_38 : f32 to vector<16x128xf32>
    %65 = arith.mulf %64, %63 : vector<16x128xf32>
    %cst_39 = arith.constant 5.000000e-01 : f32
    %66 = vector.broadcast %cst_39 : f32 to vector<16x128xf32>
    %67 = arith.addf %65, %66 : vector<16x128xf32>
    %c0_40 = arith.constant 0 : index
    %c0_41 = arith.constant 0 : index
    %68 = vector.load %arg3[%c0_40, %c0_41] : memref<16x256xf32, #tpu.memory_space<vmem>>, vector<16x128xf32>
    tpu.vector_store %arg3[%c0_40, %c0_41], %67 {strides = array<i32>} : memref<16x256xf32, #tpu.memory_space<vmem>>, vector<16x128xf32>,
    %c0_42 = arith.constant 0 : index
    %c128 = arith.constant 128 : index
    %69 = vector.load %arg1[%c0_42, %c128] : memref<32x256xf32, #tpu.memory_space<vmem>>, vector<32x128xf32>
    %c0_43 = arith.constant 0 : index
    %c0_44 = arith.constant 0 : index
    %70 = vector.load %arg2[%c0_43, %c0_44] : memref<96x128xf32, #tpu.memory_space<vmem>>, vector<32x32xf32>
    %cst_45 = arith.constant dense<0.000000e+00> : vector<32x128xf32>
    %71 = tpu.matmul %70, %69, %cst_45 {dimension_numbers = #tpu.dot_dimension_numbers<[1], [0], [0], [1], [0, 0, 1, 1], [], []>} : vector<32x32xf32>, vector<32x128xf32>, vector<32x128xf32> -> vector<32x128xf32>
    %c64_46 = arith.constant 64 : index
    %c0_47 = arith.constant 0 : index
    %72 = vector.load %arg2[%c64_46, %c0_47] : memref<96x128xf32, #tpu.memory_space<vmem>>, vector<32x1xf32>
    %73 = vector.broadcast %72 : vector<32x1xf32> to vector<32x128xf32>
    %74 = arith.addf %71, %73 : vector<32x128xf32>
    %cst_48 = arith.constant 0.000000e+00 : f32
    %75 = vector.broadcast %cst_48 : f32 to vector<32x128xf32>
    %76 = arith.maximumf %74, %75 : vector<32x128xf32>
    %c0_49 = arith.constant 0 : index
    %c32_50 = arith.constant 32 : index
    %77 = vector.load %arg2[%c0_49, %c32_50] : memref<96x128xf32, #tpu.memory_space<vmem>>, vector<32x32xf32>
    %cst_51 = arith.constant dense<0.000000e+00> : vector<32x128xf32>
    %78 = tpu.matmul %77, %76, %cst_51 {dimension_numbers = #tpu.dot_dimension_numbers<[1], [0], [0], [1], [0, 0, 1, 1], [], []>} : vector<32x32xf32>, vector<32x128xf32>, vector<32x128xf32> -> vector<32x128xf32>
    %c64_52 = arith.constant 64 : index
    %c1_53 = arith.constant 1 : index
    %79 = vector.load %arg2[%c64_52, %c1_53] : memref<96x128xf32, #tpu.memory_space<vmem>>, vector<32x1xf32>
    %80 = vector.broadcast %79 : vector<32x1xf32> to vector<32x128xf32>
    %81 = arith.addf %78, %80 : vector<32x128xf32>
    %cst_54 = arith.constant 0.000000e+00 : f32
    %82 = vector.broadcast %cst_54 : f32 to vector<32x128xf32>
    %83 = arith.maximumf %81, %82 : vector<32x128xf32>
    %84 = arith.addf %76, %83 : vector<32x128xf32>
    %c0_55 = arith.constant 0 : index
    %c64_56 = arith.constant 64 : index
    %85 = vector.load %arg2[%c0_55, %c64_56] : memref<96x128xf32, #tpu.memory_space<vmem>>, vector<32x32xf32>
    %cst_57 = arith.constant dense<0.000000e+00> : vector<32x128xf32>
    %86 = tpu.matmul %85, %84, %cst_57 {dimension_numbers = #tpu.dot_dimension_numbers<[1], [0], [0], [1], [0, 0, 1, 1], [], []>} : vector<32x32xf32>, vector<32x128xf32>, vector<32x128xf32> -> vector<32x128xf32>
    %c64_58 = arith.constant 64 : index
    %c2_59 = arith.constant 2 : index
    %87 = vector.load %arg2[%c64_58, %c2_59] : memref<96x128xf32, #tpu.memory_space<vmem>>, vector<32x1xf32>
    %88 = vector.broadcast %87 : vector<32x1xf32> to vector<32x128xf32>
    %89 = arith.addf %86, %88 : vector<32x128xf32>
    %cst_60 = arith.constant 0.000000e+00 : f32
    %90 = vector.broadcast %cst_60 : f32 to vector<32x128xf32>
    %91 = arith.maximumf %89, %90 : vector<32x128xf32>
    %92 = arith.addf %84, %91 : vector<32x128xf32>
    %c0_61 = arith.constant 0 : index
    %c96_62 = arith.constant 96 : index
    %93 = vector.load %arg2[%c0_61, %c96_62] : memref<96x128xf32, #tpu.memory_space<vmem>>, vector<32x32xf32>
    %cst_63 = arith.constant dense<0.000000e+00> : vector<32x128xf32>
    %94 = tpu.matmul %93, %92, %cst_63 {dimension_numbers = #tpu.dot_dimension_numbers<[1], [0], [0], [1], [0, 0, 1, 1], [], []>} : vector<32x32xf32>, vector<32x128xf32>, vector<32x128xf32> -> vector<32x128xf32>
    %c64_64 = arith.constant 64 : index
    %c3_65 = arith.constant 3 : index
    %95 = vector.load %arg2[%c64_64, %c3_65] : memref<96x128xf32, #tpu.memory_space<vmem>>, vector<32x1xf32>
    %96 = vector.broadcast %95 : vector<32x1xf32> to vector<32x128xf32>
    %97 = arith.addf %94, %96 : vector<32x128xf32>
    %cst_66 = arith.constant 0.000000e+00 : f32
    %98 = vector.broadcast %cst_66 : f32 to vector<32x128xf32>
    %99 = arith.maximumf %97, %98 : vector<32x128xf32>
    %100 = arith.addf %92, %99 : vector<32x128xf32>
    %c32_67 = arith.constant 32 : index
    %c0_68 = arith.constant 0 : index
    %101 = vector.load %arg2[%c32_67, %c0_68] : memref<96x128xf32, #tpu.memory_space<vmem>>, vector<32x32xf32>
    %cst_69 = arith.constant dense<0.000000e+00> : vector<32x128xf32>
    %102 = tpu.matmul %101, %100, %cst_69 {dimension_numbers = #tpu.dot_dimension_numbers<[1], [0], [0], [1], [0, 0, 1, 1], [], []>} : vector<32x32xf32>, vector<32x128xf32>, vector<32x128xf32> -> vector<32x128xf32>
    %c64_70 = arith.constant 64 : index
    %c4_71 = arith.constant 4 : index
    %103 = vector.load %arg2[%c64_70, %c4_71] : memref<96x128xf32, #tpu.memory_space<vmem>>, vector<32x1xf32>
    %104 = vector.broadcast %103 : vector<32x1xf32> to vector<32x128xf32>
    %105 = arith.addf %102, %104 : vector<32x128xf32>
    %cst_72 = arith.constant 0.000000e+00 : f32
    %106 = vector.broadcast %cst_72 : f32 to vector<32x128xf32>
    %107 = arith.maximumf %105, %106 : vector<32x128xf32>
    %108 = arith.addf %100, %107 : vector<32x128xf32>
    %c32_73 = arith.constant 32 : index
    %c32_74 = arith.constant 32 : index
    %109 = vector.load %arg2[%c32_73, %c32_74] : memref<96x128xf32, #tpu.memory_space<vmem>>, vector<32x32xf32>
    %cst_75 = arith.constant dense<0.000000e+00> : vector<32x128xf32>
    %110 = tpu.matmul %109, %108, %cst_75 {dimension_numbers = #tpu.dot_dimension_numbers<[1], [0], [0], [1], [0, 0, 1, 1], [], []>} : vector<32x32xf32>, vector<32x128xf32>, vector<32x128xf32> -> vector<32x128xf32>
    %c64_76 = arith.constant 64 : index
    %c5_77 = arith.constant 5 : index
    %111 = vector.load %arg2[%c64_76, %c5_77] : memref<96x128xf32, #tpu.memory_space<vmem>>, vector<32x1xf32>
    %112 = vector.broadcast %111 : vector<32x1xf32> to vector<32x128xf32>
    %113 = arith.addf %110, %112 : vector<32x128xf32>
    %cst_78 = arith.constant 0.000000e+00 : f32
    %114 = vector.broadcast %cst_78 : f32 to vector<32x128xf32>
    %115 = arith.maximumf %113, %114 : vector<32x128xf32>
    %116 = arith.addf %108, %115 : vector<32x128xf32>
    %c32_79 = arith.constant 32 : index
    %c64_80 = arith.constant 64 : index
    %117 = vector.load %arg2[%c32_79, %c64_80] : memref<96x128xf32, #tpu.memory_space<vmem>>, vector<32x32xf32>
    %cst_81 = arith.constant dense<0.000000e+00> : vector<32x128xf32>
    %118 = tpu.matmul %117, %116, %cst_81 {dimension_numbers = #tpu.dot_dimension_numbers<[1], [0], [0], [1], [0, 0, 1, 1], [], []>} : vector<32x32xf32>, vector<32x128xf32>, vector<32x128xf32> -> vector<32x128xf32>
    %c64_82 = arith.constant 64 : index
    %c6_83 = arith.constant 6 : index
    %119 = vector.load %arg2[%c64_82, %c6_83] : memref<96x128xf32, #tpu.memory_space<vmem>>, vector<32x1xf32>
    %120 = vector.broadcast %119 : vector<32x1xf32> to vector<32x128xf32>
    %121 = arith.addf %118, %120 : vector<32x128xf32>
    %cst_84 = arith.constant 0.000000e+00 : f32
    %122 = vector.broadcast %cst_84 : f32 to vector<32x128xf32>
    %123 = arith.maximumf %121, %122 : vector<32x128xf32>
    %124 = arith.addf %116, %123 : vector<32x128xf32>
    %c32_85 = arith.constant 32 : index
    %c96_86 = arith.constant 96 : index
    %125 = vector.load %arg2[%c32_85, %c96_86] : memref<96x128xf32, #tpu.memory_space<vmem>>, vector<16x32xf32>
    %cst_87 = arith.constant dense<0.000000e+00> : vector<16x128xf32>
    %126 = tpu.matmul %125, %124, %cst_87 {dimension_numbers = #tpu.dot_dimension_numbers<[1], [0], [0], [1], [0, 0, 1, 1], [], []>} : vector<16x32xf32>, vector<32x128xf32>, vector<16x128xf32> -> vector<16x128xf32>
    %c64_88 = arith.constant 64 : index
    %c7_89 = arith.constant 7 : index
    %127 = vector.load %arg2[%c64_88, %c7_89] : memref<96x128xf32, #tpu.memory_space<vmem>>, vector<16x1xf32>
    %128 = vector.broadcast %127 : vector<16x1xf32> to vector<16x128xf32>
    %129 = arith.addf %126, %128 : vector<16x128xf32>
    %cst_90 = arith.constant 5.000000e-01 : f32
    %130 = vector.broadcast %cst_90 : f32 to vector<16x128xf32>
    %131 = arith.mulf %130, %129 : vector<16x128xf32>
    %132 = math.tanh %131 : vector<16x128xf32>
    %cst_91 = arith.constant 5.000000e-01 : f32
    %133 = vector.broadcast %cst_91 : f32 to vector<16x128xf32>
    %134 = arith.mulf %133, %132 : vector<16x128xf32>
    %cst_92 = arith.constant 5.000000e-01 : f32
    %135 = vector.broadcast %cst_92 : f32 to vector<16x128xf32>
    %136 = arith.addf %134, %135 : vector<16x128xf32>
    %c0_93 = arith.constant 0 : index
    %c128_94 = arith.constant 128 : index
    %137 = vector.load %arg3[%c0_93, %c128_94] : memref<16x256xf32, #tpu.memory_space<vmem>>, vector<16x128xf32>
    tpu.vector_store %arg3[%c0_93, %c128_94], %136 {strides = array<i32>} : memref<16x256xf32, #tpu.memory_space<vmem>>, vector<16x128xf32>,
    return
  }
  func.func @transform_0(%arg0: i32) -> (i32, i32) {
    %c0_i32 = arith.constant 0 : i32
    %c0_i32_0 = arith.constant 0 : i32
    return %c0_i32, %arg0 : i32, i32
  }
  func.func @transform_1(%arg0: i32) -> (i32, i32) {
    %c0_i32 = arith.constant 0 : i32
    %c0_i32_0 = arith.constant 0 : i32
    %c0_i32_1 = arith.constant 0 : i32
    return %c0_i32, %c0_i32_0 : i32, i32
  }
  func.func @transform_2(%arg0: i32) -> (i32, i32) {
    %c0_i32 = arith.constant 0 : i32
    %c0_i32_0 = arith.constant 0 : i32
    return %c0_i32, %arg0 : i32, i32
  }
}

</mosaic_0001>

<bundles_post_ra>
// kernel: tpu_custom_call.1
= control target key start
LH: loop header
LB: loop body
LE: loop exit
PB: predicated region body
PF: predicated region fallthrough
CT: control target
= control target key end

     0   :  { %7 = vsyncpa [#allocation3], 0  ;;  %s3236_s0 = inlined_call_operand.hbm [shape: f32[32,256], index: 0, kind: input, shape index: {}]   ;;  %s3237_s1 = inlined_call_operand.hbm [shape: f32[96,128], index: 1, kind: input, shape index: {}]   ;;  %s3238_s2 = inlined_call_operand.hbm [shape: f32[16,256], index: 2, kind: output, shape index: {}]  }
   0x1   :  { %8 = vsyncpa [#allocation6], 0 }
   0x2   :  { %9 = vsyncpa [#allocation4], 0  ;;  %s2701_s9 = smov [#allocation2]   ;;  %s2629_s13 = scalar_lea.hbm %s3236_s0, 1024 }
   0x3   :  { %s15_s10 = sshll.u32 %s2701_s9, 4  ;;  %p2630_p0 = scmp.ne.s32.totalorder %s3236_s0, %s2629_s13  ;;  %s16_s10 = int_to_ptr.vmem [resolvable:$true] %s15_s10 }
   0x4   :  { %p2633_p1 = scmp.lt.u32.totalorder %s2629_s13, %s3236_s0 }
   0x6   :  { %p2635_p2 = pnand %p2633_p1, %p2630_p0 }
   0x8   :  { %2638 = shalt.err (!%p2635_p2)
}
   0x9   :  { %s2639_s18 = scalar_lea.vmem %s16_s10, 1024  ;;  %p2644_p4 = scmp.lt.s32.totalorder %s16_s10, %s16_s10 }
   0xa   :  { %p2640_p3 = scmp.ne.s32.totalorder %s16_s10, %s2639_s18  ;;  %p2645_p5 = scmp.lt.s32.totalorder %s2639_s18, %s2639_s18 }
   0xc   :  { %p2646_p6 = por %p2645_p5, %p2644_p4 }
   0xe   :  { %p2647_p7 = pnand %p2646_p6, %p2640_p3 }
  0x10   :  { %2650 = shalt.err (!%p2647_p7)
}
  0x11   :  { %s2702_s19 = smov 256   ;;  %s2703_s20 = smov 16  }
  0x12   :  { %21 = dma.hbm_to_vmem [thread:$0]  %s3236_s0, 1024, %s16_s10, [#allocation3], %s2702_s19, %s2702_s19, %s2703_s20  }
  0x13   :  { %s2704_s23 = smov [#allocation5]   ;;  %s2651_s27 = scalar_lea.hbm %s3237_s1, 1536 }
  0x14   :  { %s27_s24 = sshll.u32 %s2704_s23, 4  ;;  %p2652_p8 = scmp.ne.s32.totalorder %s3237_s1, %s2651_s27  ;;  %s28_s24 = int_to_ptr.vmem [resolvable:$true] %s27_s24 }
  0x15   :  { %p2655_p9 = scmp.lt.u32.totalorder %s2651_s27, %s3237_s1 }
  0x17   :  { %p2657_p10 = pnand %p2655_p9, %p2652_p8 }
  0x19   :  { %2660 = shalt.err (!%p2657_p10)
}
  0x1a   :  { %s2661_s4 = scalar_lea.vmem %s28_s24, 1536  ;;  %p2666_p12 = scmp.lt.s32.totalorder %s28_s24, %s28_s24 }
  0x1b   :  { %p2662_p11 = scmp.ne.s32.totalorder %s28_s24, %s2661_s4  ;;  %p2667_p13 = scmp.lt.s32.totalorder %s2661_s4, %s2661_s4 }
  0x1d   :  { %p2668_p0 = por %p2667_p13, %p2666_p12 }
  0x1f   :  { %p2669_p1 = pnand %p2668_p0, %p2662_p11 }
  0x21   :  { %2672 = shalt.err (!%p2669_p1)
}
  0x22   :  { %s2705_s0 = smov 128   ;;  %s2706_s5 = smov 8  }
  0x23   :  { %33 = dma.hbm_to_vmem [thread:$0]  %s3237_s1, 1536, %s28_s24, [#allocation6], %s2705_s0, %s2705_s0, %s2706_s5  }
  0x24   :  { %2695 = dma.done.wait [#allocation3], 1024  }
  0x25   :  { %2696 = vsyncadd [#allocation3], 4294966272 }
  0x26   :  { %2697 = dma.done.wait [#allocation6], 1536  }
  0x27   :  { %2698 = vsyncadd [#allocation6], 4294965760  ;;  %v2707_v0 = vmov 0   ;;  %vm72_vm0 = vcmask 261120   ;;  %v40_v1 = vld [vmem:[#allocation2] sm:$0xff]  ;;  %v41_v2 = vld [vmem:[#allocation2 + $0x10] sm:$0xff] }
  0x28   :  { %2591 = vset.pattern.permute.xlu0 %v2707_v0  ;;  %2592 = vset.pattern.permute.xlu1 %v2707_v0  ;;  %v42_v3 = vld [vmem:[#allocation2 + $0x20] sm:$0xff]  ;;  %v2445_v4 = vpack.c.bf16 %v41_v2, %v40_v1  ;;  %v43_v5 = vld [vmem:[#allocation2 + $0x30] sm:$0xff]  ;;  %v2773_v10 = vld [vmem:[#allocation5 + $0x48] sm:$0xff]  ;;  %s2708_s1 = smov 96   ;;  %v2709_v15 = vmov 1   ;;  %s2710_s8 = smov 64  }
  0x29   :  { %v2763_v6 = vld [vmem:[#allocation5] sm:$0xff]  ;;  %v2449_v7 = vpack.c.bf16 %v43_v5, %v42_v3  ;;  %v2770_v9 = vld [vmem:[#allocation5 + $0x50] sm:$0xff]  ;;  %v2775_v11 = vld [vmem:[#allocation5 + $0x58] sm:$0xff]  ;;  %v2711_v41 = vmov 2   ;;  %s2712_s9 = smov 32   ;;  %s2718_s10 = smov [#allocation7]  }
  0x2a   :  { %2235 = vmatprep.mubr.msk.f32.mxu0 %vm72_vm0, %v2763_v6  ;;  %v2767_v8 = vld [vmem:[#allocation5 + $0x40] sm:$0xff]  ;;  %2446 = vmatprep.subr.bf16.mxu0 %v2445_v4  ;;  %v2778_v12 = vld [vmem:[#allocation5 + $0x8] sm:$0xff]  ;;  %v2781_v13 = vld [vmem:[#allocation5 + $0x10] sm:$0xff]  ;;  %s2030_s11 = sshll.u32 %s2718_s10, 4  ;;  %s2031_s11 = int_to_ptr.vmem [resolvable:$true] %s2030_s11 }
  0x2b   :  { %54 = vperm.xlu0 %2591, %v2767_v8   ;;  %2448 = vmatpush3.bf16.msra.mxu0 %v2445_v4  ;;  %v2789_v14 = vld [vmem:[#allocation5 + $0x18] sm:$0xff]  ;;  %v2713_v4 = vmov 3   ;;  %s2673_s12 = scalar_lea.vmem %s2031_s11, 512  ;;  %p2678_p3 = scmp.lt.s32.totalorder %s2031_s11, %s2031_s11 }
  0x2c   :  { %64 = vperm.xlu1 %2592, %v2770_v9   ;;  %2450 = vmatprep.subr.bf16.mxu0 %v2449_v7  ;;  %p2674_p2 = scmp.ne.s32.totalorder %s2031_s11, %s2673_s12  ;;  %p2679_p4 = scmp.lt.s32.totalorder %s2673_s12, %s2673_s12 }
  0x2e   :  { %p2680_p5 = por %p2679_p4, %p2678_p3 }
  0x2f   :  { %59 = vperm.xlu0 %2591, %v2773_v10   ;;  %2452 = vmatpush3.bf16.msra.mxu0 %v2449_v7 }
  0x30   :  { %69 = vperm.xlu1 %2592, %v2775_v11   ;;  %p2681_p6 = pnand %p2680_p5, %p2674_p2 }
  0x32   :  { %2236 = vmatmul.mubr.msk.f32.vlgmr.msra.gmra.mrb[0].mxu0 %vm72_vm0, %v2778_v12 }
  0x33   :  { %190 = vrot.lane.b32.xlu0 %v2763_v6, %s2708_s1  ;;  %2238 = vmatprep.mubr.msk.f32.mxu0 %vm72_vm0, %v2781_v13 }
  0x34   :  { %192 = vrot.lane.b32.xlu1 %v2778_v12, %s2708_s1  ;;  %2593 = vset.pattern.permute.xlu0 %v2709_v15 }
  0x35   :  { %2594 = vset.pattern.permute.xlu1 %v2709_v15 }
  0x36   :  { %2239 = vmatmul.mubr.msk.f32.gmra.mrb[2].mxu0 %vm72_vm0, %v2789_v14 }
  0x37   :  { %194 = vrot.lane.b32.xlu0 %v2781_v13, %s2708_s1 }
  0x38   :  { %196 = vrot.lane.b32.xlu1 %v2789_v14, %s2708_s1 }
  0x3b   :  { %175 = vperm.xlu0 %2593, %v2767_v8  }
  0x3c   :  { %179 = vperm.xlu1 %2594, %v2773_v10  }
  0x3f   :  { %187 = vperm.xlu0 %2593, %v2775_v11  }
  0x40   :  { %183 = vperm.xlu1 %2594, %v2770_v9  }
  0x43   :  { %317 = vrot.lane.b32.xlu0 %v2778_v12, %s2710_s8 }
  0x44   :  { %315 = vrot.lane.b32.xlu1 %v2763_v6, %s2710_s8  ;;  %2596 = vset.pattern.permute.xlu0 %v2711_v41 }
  0x45   :  { %2595 = vset.pattern.permute.xlu1 %v2711_v41 }
  0x47   :  { %321 = vrot.lane.b32.xlu0 %v2789_v14, %s2710_s8 }
  0x48   :  { %319 = vrot.lane.b32.xlu1 %v2781_v13, %s2710_s8 }
  0x4b   :  { %304 = vperm.xlu0 %2596, %v2773_v10  }
  0x4c   :  { %300 = vperm.xlu1 %2595, %v2767_v8  }
  0x4f   :  { %440 = vrot.lane.b32.xlu0 %v2763_v6, %s2712_s9 }
  0x50   :  { %308 = vperm.xlu1 %2595, %v2770_v9   ;;  %2597 = vset.pattern.permute.xlu0 %v2713_v4 }
  0x53   :  { %444 = vrot.lane.b32.xlu0 %v2781_v13, %s2712_s9 }
  0x54   :  { %312 = vperm.xlu1 %2595, %v2775_v11  }
  0x57   :  { %425 = vperm.xlu0 %2597, %v2767_v8  }
  0x58   :  { %442 = vrot.lane.b32.xlu1 %v2778_v12, %s2712_s9 }
  0x59   :  { %2598 = vset.pattern.permute.xlu1 %v2713_v4 }
  0x5b   :  { %437 = vperm.xlu0 %2597, %v2775_v11  }
  0x5c   :  { %446 = vrot.lane.b32.xlu1 %v2789_v14, %s2712_s9 }
  0x60   :  { %429 = vperm.xlu1 %2598, %v2773_v10  }
  0x64   :  { %433 = vperm.xlu1 %2598, %v2770_v9  }
  0xaa   :  { %v55_v16 = vpop.permute.xlu0 %54 }
  0xab   :  { %v65_v19 = vpop.permute.xlu1 %64 }
  0xae   :  { %v60_v17 = vpop.permute.xlu0 %59 }
  0xaf   :  { %v70_v25 = vpop.permute.xlu1 %69 }
  0xb2   :  { %v191_v18 = vpop.permute.xlu0 %190 }
  0xb3   :  { %2249 = vmatprep.mubr.msk.f32.mxu1 %vm72_vm0, %v191_v18  ;;  %v193_v35 = vpop.permute.xlu1 %192 }
  0xb6   :  { %v195_v36 = vpop.permute.xlu0 %194 }
  0xb7   :  { %v197_v37 = vpop.permute.xlu1 %196 }
  0xba   :  { %v176_v42 = vpop.permute.xlu0 %175 }
  0xbb   :  { %v180_v38 = vpop.permute.xlu1 %179 }
  0xbe   :  { %v188_v48 = vpop.permute.xlu0 %187 }
  0xbf   :  { %v184_v39 = vpop.permute.xlu1 %183 }
  0xc2   :  { %v318_v62 = vpop.permute.xlu0 %317 }
  0xc3   :  { %v316_v40 = vpop.permute.xlu1 %315 }
  0xc4   :  { %2263 = vmatprep.mubr.msk.f32.mxu0 %vm72_vm0, %v316_v40  ;;  %v2856_v40 = vld [vmem:[#allocation5 + $0x30] sm:$0xff] }
  0xc6   :  { %v322_v1 = vpop.permute.xlu0 %321 }
  0xc7   :  { %v320_v63 = vpop.permute.xlu1 %319 }
  0xca   :  { %v305_v2 = vpop.permute.xlu0 %304 }
  0xcb   :  { %v301_v5 = vpop.permute.xlu1 %300 }
  0xce   :  { %v441_v3 = vpop.permute.xlu0 %440 }
  0xcf   :  { %v309_v7 = vpop.permute.xlu1 %308 }
 0x105   :  { %v2237_v20 = vpop.f32.mrb[0].mxu0 }
 0x106   :  { %v157_v21 = vadd.f32 %v2237_v20, %v60_v17  ;;  %v151_v22 = vpop.f32.mrb[1].mxu0 }
 0x107   :  { %v152_v23 = vadd.f32 %v151_v22, %v55_v16 }
 0x108   :  { %v171_v24 = vmax.f32 %v157_v21, 0.0  ;;  %v313_v21 = vpop.permute.xlu1 %312 }
 0x109   :  { %v170_v26 = vmax.f32 %v152_v23, 0.0  ;;  %v2240_v27 = vpop.f32.mrb[2].mxu0 }
 0x10a   :  { %v167_v28 = vadd.f32 %v2240_v27, %v70_v25  ;;  %v161_v29 = vpop.f32.mrb[3].mxu0 }
 0x10b   :  { %v162_v30 = vadd.f32 %v161_v29, %v65_v19  ;;  %v2453_v31 = vpack.c.bf16 %v171_v24, %v170_v26 }
 0x10c   :  { %v173_v32 = vmax.f32 %v167_v28, 0.0 }
 0x10d   :  { %v172_v33 = vmax.f32 %v162_v30, 0.0  ;;  %2454 = vmatprep.subr.bf16.mxu1 %v2453_v31 }
 0x10e   :  { %2456 = vmatpush3.bf16.msra.mxu1 %v2453_v31 }
 0x10f   :  { %v2457_v34 = vpack.c.bf16 %v173_v32, %v172_v33 }
 0x111   :  { %2458 = vmatprep.subr.bf16.mxu1 %v2457_v34 }
 0x112   :  { %2460 = vmatpush3.bf16.msra.mxu1 %v2457_v34 }
 0x115   :  { %2250 = vmatmul.mubr.msk.f32.vlgmr.msra.gmra.mrb[0].mxu1 %vm72_vm0, %v193_v35  ;;  %v443_v35 = vpop.permute.xlu1 %442 }
 0x116   :  { %2252 = vmatprep.mubr.msk.f32.mxu1 %vm72_vm0, %v195_v36  ;;  %v445_v36 = vpop.permute.xlu0 %444 }
 0x119   :  { %2253 = vmatmul.mubr.msk.f32.gmra.mrb[2].mxu1 %vm72_vm0, %v197_v37  ;;  %v447_v37 = vpop.permute.xlu1 %446 }
 0x11a   :  { %2277 = vmatprep.mubr.msk.f32.mxu1 %vm72_vm0, %v441_v3 }
 0x1e8   :  { %v2251_v43 = vpop.f32.mrb[0].mxu1 }
 0x1e9   :  { %v278_v44 = vadd.f32 %v2251_v43, %v180_v38  ;;  %v272_v45 = vpop.f32.mrb[1].mxu1  ;;  %v2845_v38 = vld [vmem:[#allocation5 + $0x20] sm:$0xff]  ;;  %v2865_v43 = vld [vmem:[#allocation5 + $0x38] sm:$0xff] }
 0x1ea   :  { %v273_v46 = vadd.f32 %v272_v45, %v176_v42  ;;  %v2861_v42 = vld [vmem:[#allocation5 + $0x28] sm:$0xff]  ;;  %v430_v45 = vpop.permute.xlu1 %429 }
 0x1eb   :  { %v292_v47 = vmax.f32 %v278_v44, 0.0  ;;  %v426_v44 = vpop.permute.xlu0 %425 }
 0x1ec   :  { %v291_v49 = vmax.f32 %v273_v46, 0.0  ;;  %v2254_v50 = vpop.f32.mrb[2].mxu1 }
 0x1ed   :  { %v296_v51 = vadd.f32 %v292_v47, %v171_v24  ;;  %v288_v52 = vadd.f32 %v2254_v50, %v188_v48  ;;  %v282_v53 = vpop.f32.mrb[3].mxu1 }
 0x1ee   :  { %v295_v54 = vadd.f32 %v291_v49, %v170_v26  ;;  %v283_v55 = vadd.f32 %v282_v53, %v184_v39  ;;  %v2714_v39 = vmov 4  }
 0x1ef   :  { %v294_v56 = vmax.f32 %v288_v52, 0.0  ;;  %2599 = vset.pattern.permute.xlu1 %v2714_v39  ;;  %2600 = vset.pattern.permute.xlu0 %v2714_v39 }
 0x1f0   :  { %v293_v57 = vmax.f32 %v283_v55, 0.0  ;;  %v2461_v58 = vpack.c.bf16 %v296_v51, %v295_v54  ;;  %554 = vperm.xlu1 %2599, %v2767_v8   ;;  %558 = vperm.xlu0 %2600, %v2773_v10   ;;  %v434_v55 = vpop.permute.xlu1 %433 }
 0x1f1   :  { %v298_v59 = vadd.f32 %v294_v56, %v173_v32 }
 0x1f2   :  { %v297_v60 = vadd.f32 %v293_v57, %v172_v33  ;;  %2462 = vmatprep.subr.bf16.mxu0 %v2461_v58 }
 0x1f3   :  { %2464 = vmatpush3.bf16.msra.mxu0 %v2461_v58 }
 0x1f4   :  { %v2465_v61 = vpack.c.bf16 %v298_v59, %v297_v60  ;;  %562 = vperm.xlu1 %2599, %v2770_v9   ;;  %690 = vrot.lane.b32.xlu0 %v2845_v38, %s2708_s1 }
 0x1f6   :  { %2466 = vmatprep.subr.bf16.mxu0 %v2465_v61 }
 0x1f7   :  { %2468 = vmatpush3.bf16.msra.mxu0 %v2465_v61 }
 0x1f8   :  { %566 = vperm.xlu1 %2599, %v2775_v11   ;;  %694 = vrot.lane.b32.xlu0 %v2856_v40, %s2708_s1 }
 0x1fa   :  { %2264 = vmatmul.mubr.msk.f32.vlgmr.msra.gmra.mrb[4].mxu0 %vm72_vm0, %v318_v62 }
 0x1fb   :  { %2266 = vmatprep.mubr.msk.f32.mxu0 %vm72_vm0, %v320_v63 }
 0x1fc   :  { %692 = vrot.lane.b32.xlu1 %v2861_v42, %s2708_s1 }
 0x1fe   :  { %2267 = vmatmul.mubr.msk.f32.gmra.mrb[6].mxu0 %vm72_vm0, %v322_v1 }
 0x1ff   :  { %2291 = vmatprep.mubr.msk.f32.mxu0 %vm72_vm0, %v2845_v38 }
 0x200   :  { %696 = vrot.lane.b32.xlu1 %v2865_v43, %s2708_s1 }
 0x2cd   :  { %v2265_v16 = vpop.f32.mrb[4].mxu0 }
 0x2ce   :  { %v403_v17 = vadd.f32 %v2265_v16, %v305_v2  ;;  %v397_v18 = vpop.f32.mrb[5].mxu0  ;;  %v555_v16 = vpop.permute.xlu1 %554 }
 0x2cf   :  { %v398_v19 = vadd.f32 %v397_v18, %v301_v5 }
 0x2d0   :  { %v417_v20 = vmax.f32 %v403_v17, 0.0 }
 0x2d1   :  { %v416_v22 = vmax.f32 %v398_v19, 0.0  ;;  %v2268_v23 = vpop.f32.mrb[6].mxu0 }
 0x2d2   :  { %v421_v24 = vadd.f32 %v417_v20, %v296_v51  ;;  %v413_v25 = vadd.f32 %v2268_v23, %v313_v21  ;;  %v407_v26 = vpop.f32.mrb[7].mxu0  ;;  %v438_v51 = vpop.permute.xlu0 %437 }
 0x2d3   :  { %v420_v27 = vadd.f32 %v416_v22, %v295_v54  ;;  %v408_v28 = vadd.f32 %v407_v26, %v309_v7  ;;  %v2715_v7 = vmov 5   ;;  %v563_v17 = vpop.permute.xlu1 %562 }
 0x2d4   :  { %v419_v29 = vmax.f32 %v413_v25, 0.0  ;;  %2602 = vset.pattern.permute.xlu1 %v2715_v7  ;;  %2601 = vset.pattern.permute.xlu0 %v2715_v7 }
 0x2d5   :  { %v418_v30 = vmax.f32 %v408_v28, 0.0  ;;  %v2469_v31 = vpack.c.bf16 %v421_v24, %v420_v27  ;;  %679 = vperm.xlu1 %2602, %v2773_v10   ;;  %675 = vperm.xlu0 %2601, %v2767_v8  }
 0x2d6   :  { %v423_v32 = vadd.f32 %v419_v29, %v298_v59  ;;  %v559_v3 = vpop.permute.xlu0 %558 }
 0x2d7   :  { %v422_v33 = vadd.f32 %v418_v30, %v297_v60  ;;  %2470 = vmatprep.subr.bf16.mxu1 %v2469_v31  ;;  %v567_v23 = vpop.permute.xlu1 %566 }
 0x2d8   :  { %2472 = vmatpush3.bf16.msra.mxu1 %v2469_v31 }
 0x2d9   :  { %v2473_v34 = vpack.c.bf16 %v423_v32, %v422_v33  ;;  %683 = vperm.xlu1 %2602, %v2770_v9   ;;  %687 = vperm.xlu0 %2601, %v2775_v11  }
 0x2da   :  { %v691_v5 = vpop.permute.xlu0 %690 }
 0x2db   :  { %2474 = vmatprep.subr.bf16.mxu1 %v2473_v34 }
 0x2dc   :  { %2476 = vmatpush3.bf16.msra.mxu1 %v2473_v34 }
 0x2dd   :  { %815 = vrot.lane.b32.xlu1 %v2845_v38, %s2710_s8  ;;  %817 = vrot.lane.b32.xlu0 %v2861_v42, %s2710_s8 }
 0x2df   :  { %2278 = vmatmul.mubr.msk.f32.vlgmr.msra.gmra.mrb[4].mxu1 %vm72_vm0, %v443_v35 }
 0x2e0   :  { %2280 = vmatprep.mubr.msk.f32.mxu1 %vm72_vm0, %v445_v36 }
 0x2e1   :  { %819 = vrot.lane.b32.xlu1 %v2856_v40, %s2710_s8  ;;  %821 = vrot.lane.b32.xlu0 %v2865_v43, %s2710_s8 }
 0x2e3   :  { %2281 = vmatmul.mubr.msk.f32.gmra.mrb[6].mxu1 %vm72_vm0, %v447_v37  ;;  %v693_v37 = vpop.permute.xlu1 %692 }
 0x2e4   :  { %2305 = vmatprep.mubr.msk.f32.mxu1 %vm72_vm0, %v691_v5 }
 0x3b2   :  { %v2279_v46 = vpop.f32.mrb[4].mxu1 }
 0x3b3   :  { %v528_v47 = vadd.f32 %v2279_v46, %v430_v45  ;;  %v522_v48 = vpop.f32.mrb[5].mxu1  ;;  %v697_v45 = vpop.permute.xlu1 %696 }
 0x3b4   :  { %v523_v49 = vadd.f32 %v522_v48, %v426_v44  ;;  %v695_v44 = vpop.permute.xlu0 %694 }
 0x3b5   :  { %v542_v50 = vmax.f32 %v528_v47, 0.0 }
 0x3b6   :  { %v541_v52 = vmax.f32 %v523_v49, 0.0  ;;  %v2282_v53 = vpop.f32.mrb[6].mxu1  ;;  %v2716_v49 = vmov 6  }
 0x3b7   :  { %v546_v54 = vadd.f32 %v542_v50, %v421_v24  ;;  %v538_v56 = vadd.f32 %v2282_v53, %v438_v51  ;;  %v532_v57 = vpop.f32.mrb[7].mxu1  ;;  %v2905_v46 = vpop.permute.xlu1 %679  ;;  %2603 = vset.pattern.permute.xlu1 %v2716_v49  ;;  %2604 = vset.pattern.permute.xlu0 %v2716_v49 }
 0x3b8   :  { %v545_v58 = vadd.f32 %v541_v52, %v420_v27  ;;  %v533_v59 = vadd.f32 %v532_v57, %v434_v55  ;;  %800 = vperm.xlu1 %2603, %v2767_v8   ;;  %804 = vperm.xlu0 %2604, %v2773_v10  }
 0x3b9   :  { %v544_v60 = vmax.f32 %v538_v56, 0.0 }
 0x3ba   :  { %v543_v61 = vmax.f32 %v533_v59, 0.0  ;;  %v2477_v62 = vpack.c.bf16 %v546_v54, %v545_v58 }
 0x3bb   :  { %v548_v63 = vadd.f32 %v544_v60, %v423_v32  ;;  %v2907_v47 = vpop.permute.xlu1 %683 }
 0x3bc   :  { %v547_v1 = vadd.f32 %v543_v61, %v422_v33  ;;  %2478 = vmatprep.subr.bf16.mxu0 %v2477_v62  ;;  %808 = vperm.xlu1 %2603, %v2770_v9  }
 0x3bd   :  { %2480 = vmatpush3.bf16.msra.mxu0 %v2477_v62  ;;  %2605 = vset.pattern.permute.xlu0 %v2707_v0 }
 0x3be   :  { %v2481_v2 = vpack.c.bf16 %v548_v63, %v547_v1  ;;  %1047 = vperm.xlu0 %2605, %v2767_v8  }
 0x3bf   :  { %v816_v48 = vpop.permute.xlu1 %815 }
 0x3c0   :  { %2482 = vmatprep.subr.bf16.mxu0 %v2481_v2  ;;  %812 = vperm.xlu1 %2603, %v2775_v11  }
 0x3c1   :  { %2484 = vmatpush3.bf16.msra.mxu0 %v2481_v2 }
 0x3c2   :  { %1062 = vperm.xlu0 %2605, %v2775_v11  }
 0x3c4   :  { %2292 = vmatmul.mubr.msk.f32.vlgmr.msra.gmra.mrb[8].mxu0 %vm72_vm0, %v2861_v42  ;;  %2606 = vset.pattern.permute.xlu1 %v2707_v0  ;;  %v676_v0 = vpop.permute.xlu0 %675 }
 0x3c5   :  { %2294 = vmatprep.mubr.msk.f32.mxu0 %vm72_vm0, %v2856_v40  ;;  %1052 = vperm.xlu1 %2606, %v2773_v10  }
 0x3c6   :  { %942 = vrot.lane.b32.xlu0 %v2861_v42, %s2712_s9 }
 0x3c7   :  { %2608 = vset.pattern.permute.xlu0 %v2709_v15 }
 0x3c8   :  { %2295 = vmatmul.mubr.msk.f32.gmra.mrb[10].mxu0 %vm72_vm0, %v2865_v43  ;;  %v688_v51 = vpop.permute.xlu0 %687 }
 0x3c9   :  { %2319 = vmatprep.mubr.msk.f32.mxu0 %vm72_vm0, %v816_v48  ;;  %1057 = vperm.xlu1 %2606, %v2770_v9  }
 0x3ca   :  { %1184 = vrot.lane.b32.xlu0 %v2778_v12, %s2708_s1 }
 0x3cd   :  { %940 = vrot.lane.b32.xlu1 %v2845_v38, %s2712_s9 }
 0x3ce   :  { %1188 = vrot.lane.b32.xlu0 %v2789_v14, %s2708_s1  ;;  %2607 = vset.pattern.permute.xlu1 %v2709_v15 }
 0x3d1   :  { %1182 = vrot.lane.b32.xlu1 %v2763_v6, %s2708_s1 }
 0x3d2   :  { %1171 = vperm.xlu0 %2608, %v2773_v10  }
 0x3d5   :  { %1186 = vrot.lane.b32.xlu1 %v2781_v13, %s2708_s1 }
 0x3d6   :  { %1307 = vrot.lane.b32.xlu0 %v2763_v6, %s2710_s8 }
 0x3d7   :  { %2609 = vset.pattern.permute.xlu0 %v2711_v41 }
 0x3d9   :  { %1167 = vperm.xlu1 %2607, %v2767_v8  }
 0x3da   :  { %1311 = vrot.lane.b32.xlu0 %v2781_v13, %s2710_s8 }
 0x3dd   :  { %1175 = vperm.xlu1 %2607, %v2770_v9  }
 0x3de   :  { %1292 = vperm.xlu0 %2609, %v2767_v8  }
 0x3e1   :  { %1179 = vperm.xlu1 %2607, %v2775_v11  }
 0x3e2   :  { %1304 = vperm.xlu0 %2609, %v2775_v11  }
 0x3e5   :  { %1309 = vrot.lane.b32.xlu1 %v2778_v12, %s2710_s8 }
 0x3e6   :  { %1434 = vrot.lane.b32.xlu0 %v2778_v12, %s2712_s9  ;;  %2610 = vset.pattern.permute.xlu1 %v2711_v41 }
 0x3e7   :  { %2612 = vset.pattern.permute.xlu0 %v2713_v4 }
 0x3e9   :  { %1313 = vrot.lane.b32.xlu1 %v2789_v14, %s2710_s8 }
 0x3ea   :  { %1438 = vrot.lane.b32.xlu0 %v2789_v14, %s2712_s9 }
 0x3ed   :  { %1296 = vperm.xlu1 %2610, %v2773_v10  }
 0x3ee   :  { %1421 = vperm.xlu0 %2612, %v2773_v10  }
 0x3f1   :  { %1300 = vperm.xlu1 %2610, %v2770_v9  }
 0x3f2   :  { %2613 = vset.pattern.permute.xlu0 %v2714_v39 }
 0x3f3   :  { %1546 = vperm.xlu0 %2613, %v2767_v8  }
 0x3f5   :  { %1432 = vrot.lane.b32.xlu1 %v2763_v6, %s2712_s9 }
 0x3f6   :  { %2611 = vset.pattern.permute.xlu1 %v2713_v4 }
 0x3f7   :  { %1558 = vperm.xlu0 %2613, %v2775_v11  }
 0x3f9   :  { %1436 = vrot.lane.b32.xlu1 %v2781_v13, %s2712_s9 }
 0x3fb   :  { %1684 = vrot.lane.b32.xlu0 %v2861_v42, %s2708_s1 }
 0x3fc   :  { %2616 = vset.pattern.permute.xlu0 %v2715_v7 }
 0x3fd   :  { %1417 = vperm.xlu1 %2611, %v2767_v8  }
 0x3ff   :  { %1688 = vrot.lane.b32.xlu0 %v2865_v43, %s2708_s1 }
 0x401   :  { %1425 = vperm.xlu1 %2611, %v2770_v9  }
 0x403   :  { %1671 = vperm.xlu0 %2616, %v2773_v10  }
 0x405   :  { %1429 = vperm.xlu1 %2611, %v2775_v11  }
 0x407   :  { %1807 = vrot.lane.b32.xlu0 %v2845_v38, %s2710_s8 }
 0x408   :  { %2617 = vset.pattern.permute.xlu0 %v2716_v49 }
 0x409   :  { %2614 = vset.pattern.permute.xlu1 %v2714_v39 }
 0x40a   :  { %1550 = vperm.xlu1 %2614, %v2773_v10  }
 0x40b   :  { %1811 = vrot.lane.b32.xlu0 %v2856_v40, %s2710_s8 }
 0x40e   :  { %1554 = vperm.xlu1 %2614, %v2770_v9  }
 0x40f   :  { %1792 = vperm.xlu0 %2617, %v2767_v8  }
 0x412   :  { %1682 = vrot.lane.b32.xlu1 %v2845_v38, %s2708_s1 }
 0x413   :  { %1804 = vperm.xlu0 %2617, %v2775_v11   ;;  %2615 = vset.pattern.permute.xlu1 %v2715_v7  ;;  %v818_v7 = vpop.permute.xlu0 %817 }
 0x416   :  { %1686 = vrot.lane.b32.xlu1 %v2856_v40, %s2708_s1 }
 0x417   :  { %1934 = vrot.lane.b32.xlu0 %v2861_v42, %s2712_s9 }
 0x41a   :  { %1667 = vperm.xlu1 %2615, %v2767_v8  }
 0x41e   :  { %1675 = vperm.xlu1 %2615, %v2770_v9  }
 0x422   :  { %1679 = vperm.xlu1 %2615, %v2775_v11   ;;  %v822_v11 = vpop.permute.xlu0 %821 }
 0x426   :  { %1809 = vrot.lane.b32.xlu1 %v2861_v42, %s2710_s8 }
 0x427   :  { %2618 = vset.pattern.permute.xlu1 %v2716_v49 }
 0x42a   :  { %1813 = vrot.lane.b32.xlu1 %v2865_v43, %s2710_s8 }
 0x42e   :  { %1796 = vperm.xlu1 %2618, %v2773_v10  }
 0x432   :  { %1800 = vperm.xlu1 %2618, %v2770_v9  }
 0x436   :  { %1932 = vrot.lane.b32.xlu1 %v2845_v38, %s2712_s9 }
 0x497   :  { %v2293_v18 = vpop.f32.mrb[8].mxu0 }
 0x498   :  { %v653_v19 = vadd.f32 %v2293_v18, %v559_v3  ;;  %v647_v20 = vpop.f32.mrb[9].mxu0  ;;  %v820_v18 = vpop.permute.xlu1 %819 }
 0x499   :  { %v648_v21 = vadd.f32 %v647_v20, %v555_v16  ;;  %v1035_v16 = vld [vmem:[#allocation2 + $0x28] sm:$0xff] }
 0x49a   :  { %v667_v22 = vmax.f32 %v653_v19, 0.0 }
 0x49b   :  { %v666_v24 = vmax.f32 %v648_v21, 0.0  ;;  %v2296_v25 = vpop.f32.mrb[10].mxu0 }
 0x49c   :  { %v2890_v26 = vadd.f32 %v667_v22, %v546_v54  ;;  %v663_v27 = vadd.f32 %v2296_v25, %v567_v23  ;;  %v657_v28 = vpop.f32.mrb[11].mxu0  ;;  %v801_v20 = vpop.permute.xlu1 %800 }
 0x49d   :  { %v2892_v29 = vadd.f32 %v666_v24, %v545_v58  ;;  %v658_v30 = vadd.f32 %v657_v28, %v563_v17  ;;  %v1036_v17 = vld [vmem:[#allocation2 + $0x38] sm:$0xff]  ;;  %v805_v23 = vpop.permute.xlu0 %804  ;;  %v2717_v28 = vmov 7  }
 0x49e   :  { %v669_v31 = vmax.f32 %v663_v27, 0.0  ;;  %v2513_v19 = vpack.c.bf16 %v1036_v17, %v1035_v16  ;;  %2619 = vset.pattern.permute.xlu1 %v2717_v28  ;;  %2620 = vset.pattern.permute.xlu0 %v2717_v28 }
 0x49f   :  { %v668_v32 = vmax.f32 %v658_v30, 0.0  ;;  %v2485_v33 = vpack.c.bf16 %v2890_v26, %v2892_v29  ;;  %930 = vperm.xlu1 %2619, %v2767_v8   ;;  %935 = vperm.xlu0 %2620, %v2773_v10  }
 0x4a0   :  { %v2896_v34 = vadd.f32 %v669_v31, %v548_v63  ;;  %v1033_v63 = vld [vmem:[#allocation2 + $0x8] sm:$0xff]  ;;  %v809_v21 = vpop.permute.xlu1 %808 }
 0x4a1   :  { %v2898_v35 = vadd.f32 %v668_v32, %v547_v1  ;;  %2486 = vmatprep.subr.bf16.mxu1 %v2485_v33  ;;  %v1034_v1 = vld [vmem:[#allocation2 + $0x18] sm:$0xff] }
 0x4a2   :  { %2488 = vmatpush3.bf16.msra.mxu1 %v2485_v33  ;;  %v2509_v5 = vpack.c.bf16 %v1034_v1, %v1033_v63 }
 0x4a3   :  { %v2489_v36 = vpack.c.bf16 %v2896_v34, %v2898_v35 }
 0x4a4   :  { %v813_v22 = vpop.permute.xlu1 %812 }
 0x4a5   :  { %2490 = vmatprep.subr.bf16.mxu1 %v2489_v36 }
 0x4a6   :  { %2492 = vmatpush3.bf16.msra.mxu1 %v2489_v36 }
 0x4a8   :  { %v1053_v24 = vpop.permute.xlu1 %1052 }
 0x4a9   :  { %2306 = vmatmul.mubr.msk.f32.vlgmr.msra.gmra.mrb[8].mxu1 %vm72_vm0, %v693_v37 }
 0x4aa   :  { %2308 = vmatprep.mubr.msk.f32.mxu1 %vm72_vm0, %v695_v44 }
 0x4ac   :  { %v1058_v25 = vpop.permute.xlu1 %1057 }
 0x4ad   :  { %2309 = vmatmul.mubr.msk.f32.gmra.mrb[10].mxu1 %vm72_vm0, %v697_v45 }
 0x57c   :  { %v2307_v15 = vpop.f32.mrb[8].mxu1 }
 0x57d   :  { %v778_v41 = vadd.f32 %v2307_v15, %v2905_v46  ;;  %v772_v4 = vpop.f32.mrb[9].mxu1 }
 0x57e   :  { %v773_v39 = vadd.f32 %v772_v4, %v676_v0 }
 0x57f   :  { %v792_v50 = vmax.f32 %v778_v41, 0.0 }
 0x580   :  { %v791_v52 = vmax.f32 %v773_v39, 0.0  ;;  %v2310_v53 = vpop.f32.mrb[10].mxu1 }
 0x581   :  { %v2997_v54 = vadd.f32 %v792_v50, %v2890_v26  ;;  %v788_v55 = vadd.f32 %v2310_v53, %v688_v51  ;;  %v782_v56 = vpop.f32.mrb[11].mxu1 }
 0x582   :  { %v3000_v57 = vadd.f32 %v791_v52, %v2892_v29  ;;  %v783_v58 = vadd.f32 %v782_v56, %v2907_v47 }
 0x583   :  { %v794_v59 = vmax.f32 %v788_v55, 0.0 }
 0x584   :  { %v793_v60 = vmax.f32 %v783_v58, 0.0  ;;  %v2493_v61 = vpack.c.bf16 %v2997_v54, %v3000_v57 }
 0x585   :  { %v3007_v62 = vadd.f32 %v794_v59, %v2896_v34 }
 0x586   :  { %v3010_v2 = vadd.f32 %v793_v60, %v2898_v35  ;;  %2494 = vmatprep.subr.bf16.mxu0 %v2493_v61 }
 0x587   :  { %2496 = vmatpush3.bf16.msra.mxu0 %v2493_v61 }
 0x588   :  { %v2497_v3 = vpack.c.bf16 %v3007_v62, %v3010_v2 }
 0x58a   :  { %2498 = vmatprep.subr.bf16.mxu0 %v2497_v3 }
 0x58b   :  { %2500 = vmatpush3.bf16.msra.mxu0 %v2497_v3 }
 0x58c   :  { %2510 = vmatprep.subr.bf16.mxu0 %v2509_v5 }
 0x58e   :  { %2320 = vmatmul.mubr.msk.f32.vlgmr.msra.gmra.mrb[12].mxu0 %vm72_vm0, %v818_v7 }
 0x58f   :  { %2512 = vmatpush3.bf16.msra.mxu0 %v2509_v5  ;;  %2322 = vmatprep.mubr.msk.f32.mxu0 %vm72_vm0, %v820_v18 }
 0x590   :  { %2514 = vmatprep.subr.bf16.mxu0 %v2513_v19 }
 0x592   :  { %2323 = vmatmul.mubr.msk.f32.gmra.mrb[14].mxu0 %vm72_vm0, %v822_v11 }
 0x593   :  { %2516 = vmatpush3.bf16.msra.mxu0 %v2513_v19  ;;  %2344 = vmatprep.mubr.msk.f32.mxu0 %vm72_vm0, %v2763_v6  ;;  %v1048_v6 = vpop.permute.xlu0 %1047 }
 0x596   :  { %2345 = vmatmul.mubr.msk.f32.vlgmr.msra.gmra.mrb[16].mxu0 %vm72_vm0, %v2778_v12  ;;  %v941_v12 = vpop.permute.xlu1 %940 }
 0x597   :  { %2347 = vmatprep.mubr.msk.f32.mxu0 %vm72_vm0, %v2781_v13  ;;  %v1063_v26 = vpop.permute.xlu0 %1062  ;;  %2333 = vmatprep.mubr.msk.f32.mxu1 %vm72_vm0, %v941_v12 }
 0x59a   :  { %2348 = vmatmul.mubr.msk.f32.gmra.mrb[18].mxu0 %vm72_vm0, %v2789_v14  ;;  %v1183_v30 = vpop.permute.xlu1 %1182 }
 0x59b   :  { %v943_v9 = vpop.permute.xlu0 %942 }
 0x59e   :  { %v1187_v31 = vpop.permute.xlu1 %1186 }
 0x59f   :  { %v1185_v27 = vpop.permute.xlu0 %1184 }
 0x5a2   :  { %v3041_v32 = vpop.permute.xlu1 %1167 }
 0x5a3   :  { %v1189_v13 = vpop.permute.xlu0 %1188 }
 0x5a6   :  { %v3043_v33 = vpop.permute.xlu1 %1175 }
 0x5a7   :  { %v3036_v14 = vpop.permute.xlu0 %1171 }
 0x5aa   :  { %v3045_v35 = vpop.permute.xlu1 %1179 }
 0x5ab   :  { %v1308_v29 = vpop.permute.xlu0 %1307 }
 0x5ac   :  { %2372 = vmatprep.mubr.msk.f32.mxu0 %vm72_vm0, %v1308_v29 }
 0x5ae   :  { %v3049_v15 = vpop.permute.xlu1 %1309 }
 0x5af   :  { %v3085_v18 = vpop.permute.xlu0 %1311 }
 0x5b2   :  { %v3059_v60 = vpop.permute.xlu1 %1313 }
 0x5b3   :  { %v3089_v11 = vpop.permute.xlu0 %1292 }
 0x5b6   :  { %v3076_v7 = vpop.permute.xlu1 %1296 }
 0x5ba   :  { %v3079_v16 = vpop.permute.xlu1 %1300 }
 0x5be   :  { %v1433_v17 = vpop.permute.xlu1 %1432 }
 0x5c2   :  { %v3087_v19 = vpop.permute.xlu1 %1436 }
 0x661   :  { %v2321_v34 = vpop.f32.mrb[12].mxu0 }
 0x662   :  { %v903_v36 = vadd.f32 %v2321_v34, %v805_v23  ;;  %v897_v37 = vpop.f32.mrb[13].mxu0 }
 0x663   :  { %v898_v44 = vadd.f32 %v897_v37, %v801_v20  ;;  %v3091_v20 = vpop.permute.xlu1 %1417 }
 0x664   :  { %v917_v45 = vmax.f32 %v903_v36, 0.0 }
 0x665   :  { %v916_v46 = vmax.f32 %v898_v44, 0.0  ;;  %v2324_v8 = vpop.f32.mrb[14].mxu0 }
 0x666   :  { %v921_v10 = vadd.f32 %v917_v45, %v2997_v54  ;;  %v913_v47 = vadd.f32 %v2324_v8, %v813_v22  ;;  %v907_v48 = vpop.f32.mrb[15].mxu0 }
 0x667   :  { %v920_v49 = vadd.f32 %v916_v46, %v3000_v57  ;;  %v908_v0 = vadd.f32 %v907_v48, %v809_v21  ;;  %v3093_v21 = vpop.permute.xlu0 %1304  ;;  %v3095_v22 = vpop.permute.xlu1 %1425 }
 0x668   :  { %v919_v41 = vmax.f32 %v913_v47, 0.0 }
 0x669   :  { %v918_v4 = vmax.f32 %v908_v0, 0.0  ;;  %v2346_v39 = vpop.f32.mrb[16].mxu0  ;;  %v2501_v50 = vpack.c.bf16 %v921_v10, %v920_v49 }
 0x66a   :  { %v923_v51 = vadd.f32 %v919_v41, %v3007_v62  ;;  %v3052_v52 = vadd.f32 %v2346_v39, %v1053_v24  ;;  %v1143_v53 = vpop.f32.mrb[17].mxu0 }
 0x66b   :  { %v922_v55 = vadd.f32 %v918_v4, %v3010_v2  ;;  %v3055_v56 = vadd.f32 %v1143_v53, %v1048_v6  ;;  %2502 = vmatprep.subr.bf16.mxu1 %v2501_v50  ;;  %v3097_v23 = vpop.permute.xlu0 %1434  ;;  %v3099_v24 = vpop.permute.xlu1 %1429 }
 0x66c   :  { %v1163_v54 = vmax.f32 %v3052_v52, 0.0  ;;  %2504 = vmatpush3.bf16.msra.mxu1 %v2501_v50 }
 0x66d   :  { %v3241_v57 = vmax.f32 %v3055_v56, 0.0  ;;  %v2349_v58 = vpop.f32.mrb[18].mxu0  ;;  %v2505_v59 = vpack.c.bf16 %v923_v51, %v922_v55 }
 0x66e   :  { %v3061_v61 = vadd.f32 %v2349_v58, %v1063_v26  ;;  %v1153_v62 = vpop.f32.mrb[19].mxu0 }
 0x66f   :  { %v2517_v63 = vpack.c.bf16 %v1163_v54, %v3241_v57  ;;  %v3067_v1 = vadd.f32 %v1153_v62, %v1058_v25  ;;  %2506 = vmatprep.subr.bf16.mxu1 %v2505_v59  ;;  %v3101_v6 = vpop.permute.xlu0 %1438  ;;  %v3103_v25 = vpop.permute.xlu1 %1550 }
 0x670   :  { %v3240_v2 = vmax.f32 %v3061_v61, 0.0  ;;  %2508 = vmatpush3.bf16.msra.mxu1 %v2505_v59 }
 0x671   :  { %v3239_v3 = vmax.f32 %v3067_v1, 0.0  ;;  %2518 = vmatprep.subr.bf16.mxu1 %v2517_v63 }
 0x673   :  { %v2521_v5 = vpack.c.bf16 %v3240_v2, %v3239_v3  ;;  %2334 = vmatmul.mubr.msk.f32.vlgmr.msra.gmra.mrb[12].mxu1 %vm72_vm0, %v943_v9  ;;  %v3105_v26 = vpop.permute.xlu0 %1421  ;;  %v3107_v12 = vpop.permute.xlu1 %1554 }
 0x674   :  { %2520 = vmatpush3.bf16.msra.mxu1 %v2517_v63  ;;  %2358 = vmatprep.mubr.msk.f32.mxu1 %vm72_vm0, %v1183_v30 }
 0x675   :  { %2522 = vmatprep.subr.bf16.mxu1 %v2521_v5 }
 0x677   :  { %v3109_v9 = vpop.permute.xlu0 %1546 }
 0x678   :  { %2524 = vmatpush3.bf16.msra.mxu1 %v2521_v5 }
 0x67b   :  { %2359 = vmatmul.mubr.msk.f32.vlgmr.msra.gmra.mrb[14].mxu1 %vm72_vm0, %v1185_v27  ;;  %v3111_v27 = vpop.permute.xlu1 %1682 }
 0x67c   :  { %2361 = vmatprep.mubr.msk.f32.mxu1 %vm72_vm0, %v1187_v31 }
 0x67f   :  { %2362 = vmatmul.mubr.msk.f32.gmra.mrb[16].mxu1 %vm72_vm0, %v1189_v13  ;;  %v3113_v13 = vpop.permute.xlu0 %1558  ;;  %v3115_v28 = vpop.permute.xlu1 %1686 }
 0x680   :  { %2386 = vmatprep.mubr.msk.f32.mxu1 %vm72_vm0, %v1433_v17 }
 0x683   :  { %v3117_v29 = vpop.permute.xlu0 %1684  ;;  %v3119_v30 = vpop.permute.xlu1 %1667 }
 0x687   :  { %v3121_v31 = vpop.permute.xlu0 %1688  ;;  %v3123_v34 = vpop.permute.xlu1 %1675 }
 0x68b   :  { %v3125_v36 = vpop.permute.xlu0 %1671  ;;  %v3127_v37 = vpop.permute.xlu1 %1679 }
 0x68f   :  { %v3129_v44 = vpop.permute.xlu0 %1807  ;;  %v3131_v45 = vpop.permute.xlu1 %1809 }
 0x693   :  { %v3133_v46 = vpop.permute.xlu0 %1811  ;;  %v3135_v8 = vpop.permute.xlu1 %1813 }
 0x697   :  { %v3137_v10 = vpop.permute.xlu0 %1792  ;;  %v3139_v47 = vpop.permute.xlu1 %1796 }
 0x69b   :  { %v3141_v48 = vpop.permute.xlu0 %1804  ;;  %v3143_v49 = vpop.permute.xlu1 %1800 }
 0x69f   :  { %v3145_v0 = vpop.permute.xlu0 %1934  ;;  %v3147_v41 = vpop.permute.xlu1 %1932 }
 0x6a0   :  { %3242 = vst [vmem:[#allocation11_spill] sm:$0xff] %v3145_v0 }
 0x6a3   :  { %v936_v4 = vpop.permute.xlu0 %935  ;;  %v931_v39 = vpop.permute.xlu1 %930 }
 0x746   :  { %v2335_v50 = vpop.f32.mrb[12].mxu1 }
 0x747   :  { %v1020_v51 = vadd.f32 %v2335_v50, %v936_v4  ;;  %v1014_v53 = vpop.f32.mrb[13].mxu1 }
 0x748   :  { %v1015_v55 = vadd.f32 %v1014_v53, %v931_v39  ;;  %v3243_v39 = vmax.f32 %v3055_v56, 0.0 }
 0x749   :  { %v1024_v58 = vmul.f32 0.5, %v1020_v51 }
 0x74a   :  { %v1023_v59 = vmul.f32 0.5, %v1015_v55 }
 0x74b   :  { %2621 = vtanh.f32 %v1024_v58 }
 0x74c   :  { %2623 = vtanh.f32 %v1023_v59 }
 0x74e   :  { %v2360_v62 = vpop.f32.mrb[14].mxu1 }
 0x74f   :  { %v1270_v63 = vadd.f32 %v2360_v62, %v3036_v14  ;;  %v1264_v5 = vpop.f32.mrb[15].mxu1 }
 0x750   :  { %v1265_v17 = vadd.f32 %v1264_v5, %v3041_v32  ;;  %v3244_v5 = vmax.f32 %v3061_v61, 0.0 }
 0x751   :  { %v1284_v3 = vmax.f32 %v1270_v63, 0.0 }
 0x752   :  { %v1283_v2 = vmax.f32 %v1265_v17, 0.0  ;;  %v2363_v57 = vpop.f32.mrb[16].mxu1 }
 0x753   :  { %v1288_v0 = vadd.f32 %v1284_v3, %v1163_v54  ;;  %v1280_v4 = vadd.f32 %v2363_v57, %v3045_v35  ;;  %v1274_v50 = vpop.f32.mrb[17].mxu1  ;;  %v3245_v54 = vmax.f32 %v3067_v1, 0.0 }
 0x754   :  { %v1287_v51 = vadd.f32 %v1283_v2, %v3243_v39  ;;  %v1275_v53 = vadd.f32 %v1274_v50, %v3043_v33 }
 0x755   :  { %v2622_v55 = vpop.eup %2621  ;;  %v1286_v58 = vmax.f32 %v1280_v4, 0.0 }
 0x756   :  { %v2624_v14 = vpop.eup %2623  ;;  %v1028_v59 = vmul.f32 0.5, %v2622_v55  ;;  %v1285_v62 = vmax.f32 %v1275_v53, 0.0  ;;  %v2525_v32 = vpack.c.bf16 %v1288_v0, %v1287_v51 }
 0x757   :  { %v1027_v63 = vmul.f32 0.5, %v2624_v14  ;;  %v1290_v17 = vadd.f32 %v1286_v58, %v3244_v5 }
 0x758   :  { %v1030_v52 = vadd.f32 0.5, %v1028_v59  ;;  %v1289_v35 = vadd.f32 %v1285_v62, %v3245_v54  ;;  %2526 = vmatprep.subr.bf16.mxu0 %v2525_v32 }
 0x759   :  { %v1029_v57 = vadd.f32 0.5, %v1027_v63  ;;  %2528 = vmatpush3.bf16.msra.mxu0 %v2525_v32 }
 0x75a   :  { %1032 = vst [vmem:[#allocation7 + $0x10] sm:$0xff] %v1030_v52  ;;  %v2529_v56 = vpack.c.bf16 %v1290_v17, %v1289_v35 }
 0x75b   :  { %1031 = vst [vmem:[#allocation7] sm:$0xff] %v1029_v57 }
 0x75c   :  { %2530 = vmatprep.subr.bf16.mxu0 %v2529_v56 }
 0x75d   :  { %2532 = vmatpush3.bf16.msra.mxu0 %v2529_v56 }
 0x760   :  { %2373 = vmatmul.mubr.msk.f32.vlgmr.msra.gmra.mrb[20].mxu0 %vm72_vm0, %v3049_v15 }
 0x761   :  { %2375 = vmatprep.mubr.msk.f32.mxu0 %vm72_vm0, %v3085_v18 }
 0x764   :  { %2376 = vmatmul.mubr.msk.f32.gmra.mrb[22].mxu0 %vm72_vm0, %v3059_v60 }
 0x765   :  { %2400 = vmatprep.mubr.msk.f32.mxu0 %vm72_vm0, %v2845_v38 }
 0x833   :  { %v2374_v33 = vpop.f32.mrb[20].mxu0 }
 0x834   :  { %v1395_v61 = vadd.f32 %v2374_v33, %v3076_v7  ;;  %v1389_v1 = vpop.f32.mrb[21].mxu0 }
 0x835   :  { %v1390_v2 = vadd.f32 %v1389_v1, %v3089_v11 }
 0x836   :  { %v1409_v3 = vmax.f32 %v1395_v61, 0.0 }
 0x837   :  { %v1408_v4 = vmax.f32 %v1390_v2, 0.0  ;;  %v2377_v50 = vpop.f32.mrb[22].mxu0 }
 0x838   :  { %v1413_v39 = vadd.f32 %v1409_v3, %v1288_v0  ;;  %v1405_v15 = vadd.f32 %v2377_v50, %v3093_v21  ;;  %v1399_v53 = vpop.f32.mrb[23].mxu0 }
 0x839   :  { %v1412_v18 = vadd.f32 %v1408_v4, %v1287_v51  ;;  %v1400_v55 = vadd.f32 %v1399_v53, %v3079_v16 }
 0x83a   :  { %v1411_v60 = vmax.f32 %v1405_v15, 0.0 }
 0x83b   :  { %v1410_v58 = vmax.f32 %v1400_v55, 0.0  ;;  %v2533_v14 = vpack.c.bf16 %v1413_v39, %v1412_v18 }
 0x83c   :  { %v1415_v38 = vadd.f32 %v1411_v60, %v1290_v17 }
 0x83d   :  { %v1414_v59 = vadd.f32 %v1410_v58, %v1289_v35  ;;  %2534 = vmatprep.subr.bf16.mxu1 %v2533_v14 }
 0x83e   :  { %2536 = vmatpush3.bf16.msra.mxu1 %v2533_v14 }
 0x83f   :  { %v2537_v7 = vpack.c.bf16 %v1415_v38, %v1414_v59 }
 0x841   :  { %2538 = vmatprep.subr.bf16.mxu1 %v2537_v7 }
 0x842   :  { %2540 = vmatpush3.bf16.msra.mxu1 %v2537_v7 }
 0x845   :  { %2387 = vmatmul.mubr.msk.f32.vlgmr.msra.gmra.mrb[18].mxu1 %vm72_vm0, %v3097_v23 }
 0x846   :  { %2389 = vmatprep.mubr.msk.f32.mxu1 %vm72_vm0, %v3087_v19 }
 0x849   :  { %2390 = vmatmul.mubr.msk.f32.gmra.mrb[20].mxu1 %vm72_vm0, %v3101_v6 }
 0x84a   :  { %2414 = vmatprep.mubr.msk.f32.mxu1 %vm72_vm0, %v3111_v27 }
 0x918   :  { %v2388_v16 = vpop.f32.mrb[18].mxu1 }
 0x919   :  { %v1520_v11 = vadd.f32 %v2388_v16, %v3105_v26  ;;  %v1514_v21 = vpop.f32.mrb[19].mxu1 }
 0x91a   :  { %v1515_v0 = vadd.f32 %v1514_v21, %v3091_v20 }
 0x91b   :  { %v1534_v51 = vmax.f32 %v1520_v11, 0.0 }
 0x91c   :  { %v1533_v62 = vmax.f32 %v1515_v0, 0.0  ;;  %v2391_v32 = vpop.f32.mrb[20].mxu1 }
 0x91d   :  { %v1538_v63 = vadd.f32 %v1534_v51, %v1413_v39  ;;  %v1530_v23 = vadd.f32 %v2391_v32, %v3099_v24  ;;  %v1524_v5 = vpop.f32.mrb[21].mxu1 }
 0x91e   :  { %v1537_v19 = vadd.f32 %v1533_v62, %v1412_v18  ;;  %v1525_v17 = vadd.f32 %v1524_v5, %v3095_v22 }
 0x91f   :  { %v1536_v6 = vmax.f32 %v1530_v23, 0.0 }
 0x920   :  { %v1535_v52 = vmax.f32 %v1525_v17, 0.0  ;;  %v2541_v54 = vpack.c.bf16 %v1538_v63, %v1537_v19 }
 0x921   :  { %v1540_v27 = vadd.f32 %v1536_v6, %v1415_v38 }
 0x922   :  { %v1539_v35 = vadd.f32 %v1535_v52, %v1414_v59  ;;  %2542 = vmatprep.subr.bf16.mxu0 %v2541_v54 }
 0x923   :  { %2544 = vmatpush3.bf16.msra.mxu0 %v2541_v54 }
 0x924   :  { %v2545_v26 = vpack.c.bf16 %v1540_v27, %v1539_v35 }
 0x926   :  { %2546 = vmatprep.subr.bf16.mxu0 %v2545_v26 }
 0x927   :  { %2548 = vmatpush3.bf16.msra.mxu0 %v2545_v26 }
 0x92a   :  { %2401 = vmatmul.mubr.msk.f32.vlgmr.msra.gmra.mrb[24].mxu0 %vm72_vm0, %v2861_v42 }
 0x92b   :  { %2403 = vmatprep.mubr.msk.f32.mxu0 %vm72_vm0, %v2856_v40 }
 0x92e   :  { %2404 = vmatmul.mubr.msk.f32.gmra.mrb[26].mxu0 %vm72_vm0, %v2865_v43 }
 0x92f   :  { %2428 = vmatprep.mubr.msk.f32.mxu0 %vm72_vm0, %v3129_v44 }
 0x9fd   :  { %v2402_v20 = vpop.f32.mrb[24].mxu0 }
 0x9fe   :  { %v1645_v22 = vadd.f32 %v2402_v20, %v3103_v25  ;;  %v1639_v24 = vpop.f32.mrb[25].mxu0 }
 0x9ff   :  { %v1640_v57 = vadd.f32 %v1639_v24, %v3109_v9 }
 0xa00   :  { %v1659_v56 = vmax.f32 %v1645_v22, 0.0 }
 0xa01   :  { %v1658_v33 = vmax.f32 %v1640_v57, 0.0  ;;  %v2405_v61 = vpop.f32.mrb[26].mxu0 }
 0xa02   :  { %v1663_v1 = vadd.f32 %v1659_v56, %v1538_v63  ;;  %v1655_v42 = vadd.f32 %v2405_v61, %v3113_v13  ;;  %v1649_v2 = vpop.f32.mrb[27].mxu0 }
 0xa03   :  { %v1662_v40 = vadd.f32 %v1658_v33, %v1537_v19  ;;  %v1650_v3 = vadd.f32 %v1649_v2, %v3107_v12 }
 0xa04   :  { %v1661_v43 = vmax.f32 %v1655_v42, 0.0 }
 0xa05   :  { %v1660_v4 = vmax.f32 %v1650_v3, 0.0  ;;  %v2549_v50 = vpack.c.bf16 %v1663_v1, %v1662_v40 }
 0xa06   :  { %v1665_v44 = vadd.f32 %v1661_v43, %v1540_v27 }
 0xa07   :  { %v1664_v39 = vadd.f32 %v1660_v4, %v1539_v35  ;;  %2550 = vmatprep.subr.bf16.mxu1 %v2549_v50 }
 0xa08   :  { %2552 = vmatpush3.bf16.msra.mxu1 %v2549_v50 }
 0xa09   :  { %v2553_v25 = vpack.c.bf16 %v1665_v44, %v1664_v39 }
 0xa0b   :  { %2554 = vmatprep.subr.bf16.mxu1 %v2553_v25 }
 0xa0c   :  { %2556 = vmatpush3.bf16.msra.mxu1 %v2553_v25 }
 0xa0f   :  { %2415 = vmatmul.mubr.msk.f32.vlgmr.msra.gmra.mrb[22].mxu1 %vm72_vm0, %v3117_v29 }
 0xa10   :  { %2417 = vmatprep.mubr.msk.f32.mxu1 %vm72_vm0, %v3115_v28 }
 0xa13   :  { %2418 = vmatmul.mubr.msk.f32.gmra.mrb[24].mxu1 %vm72_vm0, %v3121_v31 }
 0xa14   :  { %2442 = vmatprep.mubr.msk.f32.mxu1 %vm72_vm0, %v3147_v41 }
 0xae2   :  { %v2416_v12 = vpop.f32.mrb[22].mxu1 }
 0xae3   :  { %v1770_v9 = vadd.f32 %v2416_v12, %v3125_v36  ;;  %v1764_v13 = vpop.f32.mrb[23].mxu1 }
 0xae4   :  { %v1765_v15 = vadd.f32 %v1764_v13, %v3119_v30  ;;  %v1918_v30 = vld [vmem:[#allocation5 + $0x40] sm:$0xff] }
 0xae5   :  { %v1784_v53 = vmax.f32 %v1770_v9, 0.0  ;;  %1922 = vperm.xlu1 %2619, %v1918_v30  }
 0xae6   :  { %v1783_v18 = vmax.f32 %v1765_v15, 0.0  ;;  %v2419_v55 = vpop.f32.mrb[24].mxu1 }
 0xae7   :  { %v1788_v60 = vadd.f32 %v1784_v53, %v1663_v1  ;;  %v1780_v29 = vadd.f32 %v2419_v55, %v3127_v37  ;;  %v1774_v58 = vpop.f32.mrb[25].mxu1 }
 0xae8   :  { %v1787_v28 = vadd.f32 %v1783_v18, %v1662_v40  ;;  %v1775_v14 = vadd.f32 %v1774_v58, %v3123_v34  ;;  %v1919_v34 = vld [vmem:[#allocation5 + $0x48] sm:$0xff] }
 0xae9   :  { %v1786_v31 = vmax.f32 %v1780_v29, 0.0  ;;  %1927 = vperm.xlu1 %2619, %v1919_v34  }
 0xaea   :  { %v1785_v38 = vmax.f32 %v1775_v14, 0.0  ;;  %v2557_v59 = vpack.c.bf16 %v1788_v60, %v1787_v28 }
 0xaeb   :  { %v1790_v41 = vadd.f32 %v1786_v31, %v1665_v44 }
 0xaec   :  { %v1789_v7 = vadd.f32 %v1785_v38, %v1664_v39  ;;  %2558 = vmatprep.subr.bf16.mxu0 %v2557_v59 }
 0xaed   :  { %2560 = vmatpush3.bf16.msra.mxu0 %v2557_v59 }
 0xaee   :  { %v2561_v36 = vpack.c.bf16 %v1790_v41, %v1789_v7 }
 0xaf0   :  { %2562 = vmatprep.subr.bf16.mxu0 %v2561_v36 }
 0xaf1   :  { %2564 = vmatpush3.bf16.msra.mxu0 %v2561_v36 }
 0xaf4   :  { %2429 = vmatmul.mubr.msk.f32.vlgmr.msra.gmra.mrb[28].mxu0 %vm72_vm0, %v3131_v45 }
 0xaf5   :  { %2431 = vmatprep.mubr.msk.f32.mxu0 %vm72_vm0, %v3133_v46 }
 0xaf8   :  { %2432 = vmatmul.mubr.msk.f32.gmra.mrb[30].mxu0 %vm72_vm0, %v3135_v8 }
 0xb64   :  { %v1923_v52 = vpop.permute.xlu1 %1922 }
 0xb68   :  { %v1928_v54 = vpop.permute.xlu1 %1927 }
 0xbc7   :  { %v2430_v37 = vpop.f32.mrb[28].mxu0 }
 0xbc8   :  { %v1895_v16 = vadd.f32 %v2430_v37, %v3139_v47  ;;  %v1889_v11 = vpop.f32.mrb[29].mxu0 }
 0xbc9   :  { %v1890_v21 = vadd.f32 %v1889_v11, %v3137_v10  ;;  %v3246_v10 = vld [vmem:[#allocation11_spill] sm:$0xff] }
 0xbca   :  { %v1909_v0 = vmax.f32 %v1895_v16, 0.0 }
 0xbcb   :  { %v1908_v51 = vmax.f32 %v1890_v21, 0.0  ;;  %v2433_v62 = vpop.f32.mrb[30].mxu0 }
 0xbcc   :  { %v1913_v45 = vadd.f32 %v1909_v0, %v1788_v60  ;;  %v1905_v32 = vadd.f32 %v2433_v62, %v3141_v48  ;;  %v1899_v46 = vpop.f32.mrb[31].mxu0 }
 0xbcd   :  { %v1912_v63 = vadd.f32 %v1908_v51, %v1787_v28  ;;  %v1900_v8 = vadd.f32 %v1899_v46, %v3143_v49 }
 0xbce   :  { %v1911_v23 = vmax.f32 %v1905_v32, 0.0 }
 0xbcf   :  { %v1910_v5 = vmax.f32 %v1900_v8, 0.0  ;;  %v2565_v19 = vpack.c.bf16 %v1913_v45, %v1912_v63 }
 0xbd0   :  { %v1915_v17 = vadd.f32 %v1911_v23, %v1790_v41 }
 0xbd1   :  { %v1914_v6 = vadd.f32 %v1910_v5, %v1789_v7  ;;  %2566 = vmatprep.subr.bf16.mxu1 %v2565_v19 }
 0xbd2   :  { %2568 = vmatpush3.bf16.msra.mxu1 %v2565_v19 }
 0xbd3   :  { %v2569_v47 = vpack.c.bf16 %v1915_v17, %v1914_v6 }
 0xbd5   :  { %2570 = vmatprep.subr.bf16.mxu1 %v2569_v47 }
 0xbd6   :  { %2572 = vmatpush3.bf16.msra.mxu1 %v2569_v47 }
 0xbd9   :  { %2443 = vmatmul.mubr.msk.f32.vlgmr.msra.gmra.mrb[26].mxu1 %vm72_vm0, %v3246_v10 }
 0xcac   :  { %v2444_v48 = vpop.f32.mrb[26].mxu1 }
 0xcad   :  { %v2012_v27 = vadd.f32 %v2444_v48, %v1928_v54  ;;  %v2006_v35 = vpop.f32.mrb[27].mxu1 }
 0xcae   :  { %v2007_v26 = vadd.f32 %v2006_v35, %v1923_v52 }
 0xcaf   :  { %v2016_v49 = vmul.f32 0.5, %v2012_v27 }
 0xcb0   :  { %v2015_v20 = vmul.f32 0.5, %v2007_v26 }
 0xcb1   :  { %2625 = vtanh.f32 %v2016_v49 }
 0xcb2   :  { %2627 = vtanh.f32 %v2015_v20 }
 0xcbb   :  { %v2626_v22 = vpop.eup %2625 }
 0xcbc   :  { %v2628_v24 = vpop.eup %2627  ;;  %v2020_v57 = vmul.f32 0.5, %v2626_v22 }
 0xcbd   :  { %v2019_v56 = vmul.f32 0.5, %v2628_v24 }
 0xcbe   :  { %v2022_v33 = vadd.f32 0.5, %v2020_v57 }
 0xcbf   :  { %v2021_v61 = vadd.f32 0.5, %v2019_v56 }
 0xcc0   :  { %2024 = vst [vmem:[#allocation7 + $0x18] sm:$0xff] %v2022_v33 }
 0xcc1   :  { %2023 = vst [vmem:[#allocation7 + $0x8] sm:$0xff] %v2021_v61 }
 0xcc2   :  { %2684 = shalt.err (!%p2681_p6)
}
 0xcc3   :  { %s2685_s15 = scalar_lea.hbm %s3238_s2, 512 }
 0xcc4   :  { %p2686_p7 = scmp.ne.s32.totalorder %s3238_s2, %s2685_s15  ;;  %p2689_p8 = scmp.lt.u32.totalorder %s2685_s15, %s3238_s2 }
 0xcc6   :  { %p2691_p9 = pnand %p2689_p8, %p2686_p7 }
 0xcc8   :  { %2694 = shalt.err (!%p2691_p9)
}
 0xcc9   :  { %2036 = dma.vmem_to_hbm [thread:$0]  %s2031_s11, 512, %s3238_s2, [#allocation4], %s2702_s19, %s2702_s19, %s2703_s20  }
 0xcca   :  { %2699 = dma.done.wait [#allocation4], 512  }
 0xccb   :  { %2700 = vsyncadd [#allocation4], 4294966784 }
 0xccc   :  { %2040 = vsyncpa [#allocation3], 1 }
 0xccd   :  { %2041 = vsyncpa [#allocation6], 1 }
 0xcce   :  { %2042 = vsyncpa [#allocation4], 1 }

</bundles_post_ra>
